<compile_context>
chip_gen: v5e
topology: v5e:2x2
jax: 0.10.0
libtpu: 0.0.40
codegen_flags: <defaults>
</compile_context>

<pallas_src>
import jax
import jax.numpy as jnp
from jax.experimental import pallas as pl
from jax.experimental.pallas import tpu as pltpu


def _fused_kernel(x_ref, w_ref, s1_ref, b1_ref, b2_ref, o_ref):
    # x_ref : (Cin, TM)    channel-major pixel tile
    # w_ref : (Cout, Cin)  1x1 conv weight with BN2 scale pre-folded
    # s1/b1 : (Cin, 1)     folded BN1 scale / shift
    # b2    : (Cout, 1)    folded BN2 shift (scale already inside w_ref)
    # BN1 + ReLU (VPU)
    h = jnp.maximum(x_ref[...] * s1_ref[...] + b1_ref[...], 0.0)
    # 1x1 conv == (Cout, Cin) @ (Cin, TM) matmul on the MXU
    y = jnp.dot(w_ref[...], h, preferred_element_type=jnp.float32)
    # BN2 shift + ReLU (scale was folded into the weight)
    o_ref[...] = jnp.maximum(y + b2_ref[...], 0.0)


def _choose_tile(N, hw_pad, cap=2048):
    """Pick a 128-aligned pixel tile <= cap; ensure >=2 parallel grid steps
    (v7x has two TensorCores) whenever the padded pixel axis allows it."""
    tm = min(hw_pad, cap)
    steps = N * ((hw_pad + tm - 1) // tm)
    if steps < 2 and hw_pad >= 256:
        tm = max(128, ((hw_pad // 2) // 128) * 128)
    return tm


def fused_bn_relu_conv_bn_relu(x_nchw, w_oihw, bn1, bn2, eps=1e-5):
    """x_nchw: (N, Cin, H, W) float32. Returns (N, Cout, H, W) float32."""
    gamma1, beta1, mean1, var1 = bn1
    gamma2, beta2, mean2, var2 = bn2

    N, Cin, H, W = x_nchw.shape
    Cout = w_oihw.shape[0]
    HW = H * W

    # Fold BN params (inference-mode BN).
    s1 = gamma1 / jnp.sqrt(var1 + eps)
    b1 = beta1 - mean1 * s1
    s2 = gamma2 / jnp.sqrt(var2 + eps)
    b2 = beta2 - mean2 * s2

    # Fold BN2 scale into the conv weight: relu((W h)*s2 + b2) == relu((s2*W) h + b2)
    w2d = w_oihw.reshape(Cout, Cin) * s2[:, None]

    # NCHW -> (N, Cin, HW): a pure reshape, no transpose / extra HBM round trip.
    x3d = x_nchw.reshape(N, Cin, HW)

    # Pad the pixel axis once to a multiple of 128 so every kernel store is
    # lane-dense (unmasked vst).  Padded columns never mix across the Cin
    # contraction, so they are simply sliced off at the end.
    hw_pad = ((HW + 127) // 128) * 128
    if hw_pad != HW:
        x3d = jnp.pad(x3d, ((0, 0), (0, 0), (0, hw_pad - HW)))

    TM = _choose_tile(N, hw_pad, cap=2048)
    grid = (N, pl.cdiv(hw_pad, TM))

    # VMEM working set (double-buffered x/out tiles + resident weight/vectors).
    vmem_bytes = (
        2 * Cin * TM * 4          # x tile double buffer
        + 2 * Cout * TM * 4       # out tile double buffer
        + 2 * Cout * Cin * 4      # weight
        + 2 * (2 * Cin + Cout) * 128 * 4  # BN vectors (lane dim padded to 128)
    )
    cp_kwargs = dict(dimension_semantics=("parallel", "parallel"))
    if vmem_bytes > 14 * 1024 * 1024:
        # v5e's scoped-VMEM default is 16 MiB; raise the limit for big tiles
        # (v6e/v7x defaults already cover the 2048-wide tile).
        cp_kwargs["vmem_limit_bytes"] = min(int(vmem_bytes * 2), 100 * 1024 * 1024)

    cost = pl.CostEstimate(
        flops=2 * N * Cout * Cin * hw_pad,
        transcendentals=0,
        bytes_accessed=(
            N * Cin * hw_pad * 4      # x read
            + N * Cout * hw_pad * 4   # out write
            + Cout * Cin * 4          # weight
            + (2 * Cin + Cout) * 4    # BN vectors
        ),
    )

    out3d = pl.pallas_call(
        _fused_kernel,
        out_shape=jax.ShapeDtypeStruct((N, Cout, hw_pad), jnp.float32),
        grid=grid,
        in_specs=[
            # pixel tile: varies with the grid
            pl.BlockSpec((None, Cin, TM), lambda n, m: (n, 0, m)),
            # weight / BN vectors: same block every step -> stay VMEM-resident
            pl.BlockSpec((Cout, Cin), lambda n, m: (0, 0)),
            pl.BlockSpec((Cin, 1), lambda n, m: (0, 0)),
            pl.BlockSpec((Cin, 1), lambda n, m: (0, 0)),
            pl.BlockSpec((Cout, 1), lambda n, m: (0, 0)),
        ],
        out_specs=pl.BlockSpec((None, Cout, TM), lambda n, m: (n, 0, m)),
        compiler_params=pltpu.CompilerParams(**cp_kwargs),
        cost_estimate=cost,
    )(
        x3d,
        w2d,
        s1.reshape(Cin, 1),
        b1.reshape(Cin, 1),
        b2.reshape(Cout, 1),
    )

    # Drop pixel padding, then (N, Cout, HW) -> (N, Cout, H, W): free reshape.
    return out3d[:, :, :HW].reshape(N, Cout, H, W)


def _reference(x_nchw, w_oihw, bn1, bn2, eps=1e-5):
    """Plain-JAX reference for sanity checking."""
    gamma1, beta1, mean1, var1 = bn1
    gamma2, beta2, mean2, var2 = bn2
    x = (x_nchw - mean1[None, :, None, None]) / jnp.sqrt(var1 + eps)[None, :, None, None]
    x = x * gamma1[None, :, None, None] + beta1[None, :, None, None]
    x = jnp.maximum(x, 0.0)
    # 1x1 conv
    y = jnp.einsum("nchw,oc->nohw", x, w_oihw.reshape(w_oihw.shape[0], w_oihw.shape[1]))
    y = (y - mean2[None, :, None, None]) / jnp.sqrt(var2 + eps)[None, :, None, None]
    y = y * gamma2[None, :, None, None] + beta2[None, :, None, None]
    return jnp.maximum(y, 0.0)


if __name__ == "__main__":
    Cin, Cout, N, H, W = 448, 128, 1, 14, 14

    key = jax.random.PRNGKey(0)
    kx, kw, kg1, kb1, km1, kv1, kg2, kb2, km2, kv2 = jax.random.split(key, 10)

    x = jax.random.normal(kx, (N, Cin, H, W), dtype=jnp.float32)
    w = jax.random.normal(kw, (Cout, Cin, 1, 1), dtype=jnp.float32) * 0.05

    bn1 = (
        jax.random.normal(kg1, (Cin,), dtype=jnp.float32) * 0.1 + 1.0,   # gamma
        jax.random.normal(kb1, (Cin,), dtype=jnp.float32) * 0.1,         # beta
        jax.random.normal(km1, (Cin,), dtype=jnp.float32) * 0.1,         # running_mean
        jax.random.uniform(kv1, (Cin,), dtype=jnp.float32, minval=0.5, maxval=1.5),  # running_var
    )
    bn2 = (
        jax.random.normal(kg2, (Cout,), dtype=jnp.float32) * 0.1 + 1.0,
        jax.random.normal(kb2, (Cout,), dtype=jnp.float32) * 0.1,
        jax.random.normal(km2, (Cout,), dtype=jnp.float32) * 0.1,
        jax.random.uniform(kv2, (Cout,), dtype=jnp.float32, minval=0.5, maxval=1.5),
    )

    out = fused_bn_relu_conv_bn_relu(x, w, bn1, bn2)
    out = jax.block_until_ready(out)

    ref = _reference(x, w, bn1, bn2)
    assert out.shape == (N, Cout, H, W), out.shape
    assert jnp.allclose(out, ref, atol=1e-4, rtol=1e-4), float(jnp.max(jnp.abs(out - ref)))

    print("KERNEL_OK")
</pallas_src>

<mosaic_0001>
module attributes {stable_mosaic.version = 11 : i64} {
  func.func @_fused_kernel(%arg0: i32, %arg1: i32, %arg2: memref<1x448x128xf32, #tpu.memory_space<vmem>>, %arg3: memref<128x448xf32, #tpu.memory_space<vmem>>, %arg4: memref<448x1xf32, #tpu.memory_space<vmem>>, %arg5: memref<448x1xf32, #tpu.memory_space<vmem>>, %arg6: memref<128x1xf32, #tpu.memory_space<vmem>>, %arg7: memref<1x128x128xf32, #tpu.memory_space<vmem>>) attributes {dimension_semantics = [#tpu.dimension_semantics<parallel>, #tpu.dimension_semantics<parallel>], iteration_bounds = array<i64: 1, 2>, scalar_prefetch = 0 : i64, scratch_operands = 0 : i64, tpu.core_type = #tpu.core_type<tc>, window_params = [{transform_indices = @transform_0, window_bounds = array<i64: 1, 448, 128>}, {pipeline_mode = #tpu.pipeline_mode<synchronous>, transform_indices = @transform_1, window_bounds = array<i64: 128, 448>}, {pipeline_mode = #tpu.pipeline_mode<synchronous>, transform_indices = @transform_2, window_bounds = array<i64: 448, 1>}, {pipeline_mode = #tpu.pipeline_mode<synchronous>, transform_indices = @transform_3, window_bounds = array<i64: 448, 1>}, {pipeline_mode = #tpu.pipeline_mode<synchronous>, transform_indices = @transform_4, window_bounds = array<i64: 128, 1>}, {transform_indices = @transform_5, window_bounds = array<i64: 1, 128, 128>}]} {
    %c0 = arith.constant 0 : index
    %c0_0 = arith.constant 0 : index
    %c0_1 = arith.constant 0 : index
    %0 = vector.load %arg2[%c0, %c0_0, %c0_1] : memref<1x448x128xf32, #tpu.memory_space<vmem>>, vector<1x448x128xf32>
    %1 = vector.shape_cast %0 : vector<1x448x128xf32> to vector<448x128xf32>
    %c0_2 = arith.constant 0 : index
    %c0_3 = arith.constant 0 : index
    %2 = vector.load %arg4[%c0_2, %c0_3] : memref<448x1xf32, #tpu.memory_space<vmem>>, vector<448x1xf32>
    %3 = vector.broadcast %2 : vector<448x1xf32> to vector<448x128xf32>
    %4 = arith.mulf %1, %3 : vector<448x128xf32>
    %c0_4 = arith.constant 0 : index
    %c0_5 = arith.constant 0 : index
    %5 = vector.load %arg5[%c0_4, %c0_5] : memref<448x1xf32, #tpu.memory_space<vmem>>, vector<448x1xf32>
    %6 = vector.broadcast %5 : vector<448x1xf32> to vector<448x128xf32>
    %7 = arith.addf %4, %6 : vector<448x128xf32>
    %cst = arith.constant 0.000000e+00 : f32
    %8 = vector.broadcast %cst : f32 to vector<448x128xf32>
    %9 = arith.maximumf %7, %8 : vector<448x128xf32>
    %c0_6 = arith.constant 0 : index
    %c0_7 = arith.constant 0 : index
    %10 = vector.load %arg3[%c0_6, %c0_7] : memref<128x448xf32, #tpu.memory_space<vmem>>, vector<128x448xf32>
    %cst_8 = arith.constant dense<0.000000e+00> : vector<128x128xf32>
    %11 = tpu.matmul %10, %9, %cst_8 {dimension_numbers = #tpu.dot_dimension_numbers<[1], [0], [0], [1], [0, 0, 1, 1], [], []>} : vector<128x448xf32>, vector<448x128xf32>, vector<128x128xf32> -> vector<128x128xf32>
    %c0_9 = arith.constant 0 : index
    %c0_10 = arith.constant 0 : index
    %12 = vector.load %arg6[%c0_9, %c0_10] : memref<128x1xf32, #tpu.memory_space<vmem>>, vector<128x1xf32>
    %13 = vector.broadcast %12 : vector<128x1xf32> to vector<128x128xf32>
    %14 = arith.addf %11, %13 : vector<128x128xf32>
    %cst_11 = arith.constant 0.000000e+00 : f32
    %15 = vector.broadcast %cst_11 : f32 to vector<128x128xf32>
    %16 = arith.maximumf %14, %15 : vector<128x128xf32>
    %c0_12 = arith.constant 0 : index
    %c0_13 = arith.constant 0 : index
    %c0_14 = arith.constant 0 : index
    %17 = vector.load %arg7[%c0_12, %c0_13, %c0_14] : memref<1x128x128xf32, #tpu.memory_space<vmem>>, vector<1x128x128xf32>
    %18 = vector.shape_cast %17 : vector<1x128x128xf32> to vector<128x128xf32>
    %19 = vector.shape_cast %16 : vector<128x128xf32> to vector<1x128x128xf32>
    tpu.vector_store %arg7[%c0_12, %c0_13, %c0_14], %19 {strides = array<i32>} : memref<1x128x128xf32, #tpu.memory_space<vmem>>, vector<1x128x128xf32>,
    return
  }
  func.func @transform_0(%arg0: i32, %arg1: i32) -> (i32, i32, i32) {
    %c0_i32 = arith.constant 0 : i32
    %c0_i32_0 = arith.constant 0 : i32
    return %arg0, %c0_i32, %arg1 : i32, i32, i32
  }
  func.func @transform_1(%arg0: i32, %arg1: i32) -> (i32, i32) {
    %c0_i32 = arith.constant 0 : i32
    %c0_i32_0 = arith.constant 0 : i32
    %c0_i32_1 = arith.constant 0 : i32
    return %c0_i32, %c0_i32_0 : i32, i32
  }
  func.func @transform_2(%arg0: i32, %arg1: i32) -> (i32, i32) {
    %c0_i32 = arith.constant 0 : i32
    %c0_i32_0 = arith.constant 0 : i32
    %c0_i32_1 = arith.constant 0 : i32
    return %c0_i32, %c0_i32_0 : i32, i32
  }
  func.func @transform_3(%arg0: i32, %arg1: i32) -> (i32, i32) {
    %c0_i32 = arith.constant 0 : i32
    %c0_i32_0 = arith.constant 0 : i32
    %c0_i32_1 = arith.constant 0 : i32
    return %c0_i32, %c0_i32_0 : i32, i32
  }
  func.func @transform_4(%arg0: i32, %arg1: i32) -> (i32, i32) {
    %c0_i32 = arith.constant 0 : i32
    %c0_i32_0 = arith.constant 0 : i32
    %c0_i32_1 = arith.constant 0 : i32
    return %c0_i32, %c0_i32_0 : i32, i32
  }
  func.func @transform_5(%arg0: i32, %arg1: i32) -> (i32, i32, i32) {
    %c0_i32 = arith.constant 0 : i32
    %c0_i32_0 = arith.constant 0 : i32
    return %arg0, %c0_i32, %arg1 : i32, i32, i32
  }
}

</mosaic_0001>

<bundles_post_ra>
// kernel: tpu_custom_call.1
= control target key start
LH: loop header
LB: loop body
LE: loop exit
PB: predicated region body
PF: predicated region fallthrough
CT: control target
= control target key end

     0   :  { %10 = vsyncpa [#allocation4], 0  ;;  %s3306_s0 = inlined_call_operand.vmem [shape: f32[1,448,256], index: 0, kind: input, shape index: {}]   ;;  %s3307_s1 = inlined_call_operand.vmem [shape: f32[128,448], index: 1, kind: input, shape index: {}]   ;;  %s3308_s2 = inlined_call_operand.vmem [shape: f32[448,1], index: 2, kind: input, shape index: {}]   ;;  %s3309_s3 = inlined_call_operand.vmem [shape: f32[448,1], index: 3, kind: input, shape index: {}]   ;;  %s3310_s4 = inlined_call_operand.vmem [shape: f32[128,1], index: 4, kind: input, shape index: {}]   ;;  %s3311_s5 = inlined_call_operand.hbm [shape: f32[1,128,256], index: 5, kind: output, shape index: {}]  }
   0x1   :  { %12 = vsyncpa [#allocation4 + $0x1], 0  ;;  %s2195_s18 = smov 0   ;;  %s2197_s19 = smov 0  }
   0x2   :  { %s2199_s20 = smov 0   ;;  %s2201_s21 = smov 0  }
   0x3   :  { %s2203_s22 = smov 0   ;;  %s2205_s23 = smov 0  }
   0x4 LB: > { %s1990_s24 = sadd.s32 4294967295, %s2159_s23   ;;  %s1991_s25 = sadd.s32 4294967294, %s2159_s23   ;;  %s2159_s23 = sphi %s2205_s23, %s18_s23   ;;  %s2155_s22 = sphi %s2203_s22, %s3360_s22   ;;  %s2151_s21 = sphi %s2201_s21, %s3359_s21   ;;  %s2147_s20 = sphi %s2199_s20, %s3358_s20   ;;  %s2143_s19 = sphi %s2197_s19, %s3357_s19   ;;  %s2139_s18 = sphi %s2195_s18, %s3356_s18  }
   0x5   : > { %s27_s26 = sadd.s32 1, %s2155_s22  ;;  %s39_s27 = sadd.s32 1, %s2147_s20 }
   0x6   : > { %p28_p0 = scmp.ge.s32.totalorder %s27_s26, 2  ;;  %p46_p1 = scmp.ne.s32.totalorder %s2147_s20, %s2143_s19 }
   0x7   : > { %p47_p2 = scmp.eq.s32.totalorder %s2159_s23, 0  ;;  %p162_p3 = scmp.eq.s32.totalorder %s1990_s24, 1 }
   0x8   : > { %s3362_s26 = smov (%p28_p0, %s27_s26), 0  ;;  %p167_p6 = scmp.ne.s32.totalorder %s2143_s19, %s2139_s18 }
   0x9   : > { %p48_p4 = por %p47_p2, %p46_p1  ;;  %p2234_p5 = por %p162_p3, %p46_p1 }
   0xa   : > { %s35_s29 = ssub.s32 %s2155_s22, %s3362_s26  ;;  %p168_p8 = scmp.eq.s32.totalorder %s1991_s25, 1 }
   0xb   : > { %p37_p7 = scmp.eq.s32.totalorder %s35_s29, 0  ;;  %p1993_p10 = scmp.ge.s32.totalorder %s2159_s23, 2 }
   0xc   : > { %p2245_p9 = por %p168_p8, %p167_p6 }
   0xd   : > { %s2243_s30 = scalar_select %p37_p7, %s2147_s20, %s39_s27  }
   0xe   : > { %196 = sbr.rel (%p1993_p10) target bundleno = 79 (0x4f), region = 32 }
  0x13   : > { %199 = sbr.rel (!%p48_p4) target bundleno = 79 (0x4f), region = 36  ;;  %s201_s7 = sand.u32 (%p48_p4), 1, %s2147_s20  }
  0x14   : > { %s1994_s8 = sshll.u32 (%p48_p4), %s2155_s22, 3  ;;  %s2017_s9 = smul.u32 (%p48_p4), 448, %s201_s7 }
  0x15   : > { %s2257_s12 = scalar_lea.vmem (%p48_p4), %s3306_s0, %s1994_s8 }
  0x16   : > { %v346_v0 = vld [vmem:[%s2257_s12] sm:$0xff] (%p48_p4)  ;;  %v348_v1 = vld [vmem:[%s2257_s12 + $0x10] sm:$0xff] (%p48_p4)  ;;  %s2262_s13 = scalar_lea.vmem (%p48_p4), [#allocation2], %s2017_s9 }
  0x17   : > { %v350_v2 = vld [vmem:[%s2257_s12 + $0x20] sm:$0xff] (%p48_p4)  ;;  %347 = vst [vmem:[%s2262_s13] sm:$0xff] (%p48_p4), %v346_v0  ;;  %v352_v3 = vld [vmem:[%s2257_s12 + $0x30] sm:$0xff] (%p48_p4) }
  0x18   : > { %349 = vst [vmem:[%s2262_s13 + $0x8] sm:$0xff] %v348_v1  ;;  %v354_v4 = vld [vmem:[%s2257_s12 + $0x40] sm:$0xff]  ;;  %v356_v5 = vld [vmem:[%s2257_s12 + $0x50] sm:$0xff] }
  0x19   : > { %351 = vst [vmem:[%s2262_s13 + $0x10] sm:$0xff] %v350_v2  ;;  %v358_v6 = vld [vmem:[%s2257_s12 + $0x60] sm:$0xff]  ;;  %v360_v7 = vld [vmem:[%s2257_s12 + $0x70] sm:$0xff] }
  0x1a   : > { %353 = vst [vmem:[%s2262_s13 + $0x18] sm:$0xff] %v352_v3  ;;  %v362_v8 = vld [vmem:[%s2257_s12 + $0x80] sm:$0xff]  ;;  %v364_v9 = vld [vmem:[%s2257_s12 + $0x90] sm:$0xff] }
  0x1b   : > { %355 = vst [vmem:[%s2262_s13 + $0x20] sm:$0xff] %v354_v4  ;;  %v366_v10 = vld [vmem:[%s2257_s12 + $0xa0] sm:$0xff]  ;;  %v368_v11 = vld [vmem:[%s2257_s12 + $0xb0] sm:$0xff] }
  0x1c   : > { %357 = vst [vmem:[%s2262_s13 + $0x28] sm:$0xff] %v356_v5  ;;  %v370_v12 = vld [vmem:[%s2257_s12 + $0xc0] sm:$0xff]  ;;  %v372_v13 = vld [vmem:[%s2257_s12 + $0xd0] sm:$0xff] }
  0x1d   : > { %359 = vst [vmem:[%s2262_s13 + $0x30] sm:$0xff] %v358_v6  ;;  %v374_v14 = vld [vmem:[%s2257_s12 + $0xe0] sm:$0xff]  ;;  %v376_v15 = vld [vmem:[%s2257_s12 + $0xf0] sm:$0xff] }
  0x1e   : > { %361 = vst [vmem:[%s2262_s13 + $0x38] sm:$0xff] %v360_v7  ;;  %v378_v16 = vld [vmem:[%s2257_s12 + $0x100] sm:$0xff]  ;;  %v380_v17 = vld [vmem:[%s2257_s12 + $0x110] sm:$0xff] }
  0x1f   : > { %363 = vst [vmem:[%s2262_s13 + $0x40] sm:$0xff] %v362_v8  ;;  %v382_v18 = vld [vmem:[%s2257_s12 + $0x120] sm:$0xff]  ;;  %v384_v19 = vld [vmem:[%s2257_s12 + $0x130] sm:$0xff] }
  0x20   : > { %365 = vst [vmem:[%s2262_s13 + $0x48] sm:$0xff] %v364_v9  ;;  %v386_v20 = vld [vmem:[%s2257_s12 + $0x140] sm:$0xff]  ;;  %v388_v21 = vld [vmem:[%s2257_s12 + $0x150] sm:$0xff] }
  0x21   : > { %367 = vst [vmem:[%s2262_s13 + $0x50] sm:$0xff] %v366_v10  ;;  %v390_v22 = vld [vmem:[%s2257_s12 + $0x160] sm:$0xff]  ;;  %v392_v23 = vld [vmem:[%s2257_s12 + $0x170] sm:$0xff] }
  0x22   : > { %369 = vst [vmem:[%s2262_s13 + $0x58] sm:$0xff] %v368_v11  ;;  %v394_v24 = vld [vmem:[%s2257_s12 + $0x180] sm:$0xff]  ;;  %v396_v25 = vld [vmem:[%s2257_s12 + $0x190] sm:$0xff] }
  0x23   : > { %371 = vst [vmem:[%s2262_s13 + $0x60] sm:$0xff] %v370_v12  ;;  %v398_v26 = vld [vmem:[%s2257_s12 + $0x1a0] sm:$0xff]  ;;  %v400_v27 = vld [vmem:[%s2257_s12 + $0x1b0] sm:$0xff] }
  0x24   : > { %373 = vst [vmem:[%s2262_s13 + $0x68] sm:$0xff] %v372_v13  ;;  %v402_v28 = vld [vmem:[%s2257_s12 + $0x1c0] sm:$0xff]  ;;  %v404_v29 = vld [vmem:[%s2257_s12 + $0x1d0] sm:$0xff] }
  0x25   : > { %375 = vst [vmem:[%s2262_s13 + $0x70] sm:$0xff] %v374_v14  ;;  %v406_v30 = vld [vmem:[%s2257_s12 + $0x1e0] sm:$0xff]  ;;  %v408_v31 = vld [vmem:[%s2257_s12 + $0x1f0] sm:$0xff] }
  0x26   : > { %377 = vst [vmem:[%s2262_s13 + $0x78] sm:$0xff] %v376_v15  ;;  %v410_v32 = vld [vmem:[%s2257_s12 + $0x200] sm:$0xff]  ;;  %v412_v33 = vld [vmem:[%s2257_s12 + $0x210] sm:$0xff] }
  0x27   : > { %379 = vst [vmem:[%s2262_s13 + $0x80] sm:$0xff] %v378_v16  ;;  %v414_v34 = vld [vmem:[%s2257_s12 + $0x220] sm:$0xff]  ;;  %v416_v35 = vld [vmem:[%s2257_s12 + $0x230] sm:$0xff] }
  0x28   : > { %381 = vst [vmem:[%s2262_s13 + $0x88] sm:$0xff] %v380_v17  ;;  %v418_v36 = vld [vmem:[%s2257_s12 + $0x240] sm:$0xff]  ;;  %v420_v37 = vld [vmem:[%s2257_s12 + $0x250] sm:$0xff] }
  0x29   : > { %383 = vst [vmem:[%s2262_s13 + $0x90] sm:$0xff] %v382_v18  ;;  %v422_v38 = vld [vmem:[%s2257_s12 + $0x260] sm:$0xff]  ;;  %v424_v39 = vld [vmem:[%s2257_s12 + $0x270] sm:$0xff] }
  0x2a   : > { %385 = vst [vmem:[%s2262_s13 + $0x98] sm:$0xff] %v384_v19  ;;  %v426_v40 = vld [vmem:[%s2257_s12 + $0x280] sm:$0xff]  ;;  %v428_v41 = vld [vmem:[%s2257_s12 + $0x290] sm:$0xff] }
  0x2b   : > { %387 = vst [vmem:[%s2262_s13 + $0xa0] sm:$0xff] %v386_v20  ;;  %v430_v42 = vld [vmem:[%s2257_s12 + $0x2a0] sm:$0xff]  ;;  %v432_v43 = vld [vmem:[%s2257_s12 + $0x2b0] sm:$0xff] }
  0x2c   : > { %389 = vst [vmem:[%s2262_s13 + $0xa8] sm:$0xff] %v388_v21  ;;  %v434_v44 = vld [vmem:[%s2257_s12 + $0x2c0] sm:$0xff]  ;;  %v436_v45 = vld [vmem:[%s2257_s12 + $0x2d0] sm:$0xff] }
  0x2d   : > { %391 = vst [vmem:[%s2262_s13 + $0xb0] sm:$0xff] %v390_v22  ;;  %v438_v46 = vld [vmem:[%s2257_s12 + $0x2e0] sm:$0xff]  ;;  %v440_v47 = vld [vmem:[%s2257_s12 + $0x2f0] sm:$0xff] }
  0x2e   : > { %393 = vst [vmem:[%s2262_s13 + $0xb8] sm:$0xff] %v392_v23  ;;  %v442_v48 = vld [vmem:[%s2257_s12 + $0x300] sm:$0xff]  ;;  %v444_v49 = vld [vmem:[%s2257_s12 + $0x310] sm:$0xff] }
  0x2f   : > { %395 = vst [vmem:[%s2262_s13 + $0xc0] sm:$0xff] %v394_v24  ;;  %v446_v50 = vld [vmem:[%s2257_s12 + $0x320] sm:$0xff]  ;;  %v448_v51 = vld [vmem:[%s2257_s12 + $0x330] sm:$0xff] }
  0x30   : > { %397 = vst [vmem:[%s2262_s13 + $0xc8] sm:$0xff] %v396_v25  ;;  %v450_v52 = vld [vmem:[%s2257_s12 + $0x340] sm:$0xff]  ;;  %v452_v53 = vld [vmem:[%s2257_s12 + $0x350] sm:$0xff] }
  0x31   : > { %399 = vst [vmem:[%s2262_s13 + $0xd0] sm:$0xff] %v398_v26  ;;  %v454_v54 = vld [vmem:[%s2257_s12 + $0x360] sm:$0xff]  ;;  %v456_v55 = vld [vmem:[%s2257_s12 + $0x370] sm:$0xff] }
  0x32   : > { %401 = vst [vmem:[%s2262_s13 + $0xd8] sm:$0xff] %v400_v27 }
  0x33   : > { %403 = vst [vmem:[%s2262_s13 + $0xe0] sm:$0xff] %v402_v28 }
  0x34   : > { %405 = vst [vmem:[%s2262_s13 + $0xe8] sm:$0xff] %v404_v29 }
  0x35   : > { %407 = vst [vmem:[%s2262_s13 + $0xf0] sm:$0xff] %v406_v30 }
  0x36   : > { %409 = vst [vmem:[%s2262_s13 + $0xf8] sm:$0xff] %v408_v31 }
  0x37   : > { %411 = vst [vmem:[%s2262_s13 + $0x100] sm:$0xff] %v410_v32 }
  0x38   : > { %413 = vst [vmem:[%s2262_s13 + $0x108] sm:$0xff] %v412_v33 }
  0x39   : > { %415 = vst [vmem:[%s2262_s13 + $0x110] sm:$0xff] %v414_v34 }
  0x3a   : > { %417 = vst [vmem:[%s2262_s13 + $0x118] sm:$0xff] %v416_v35 }
  0x3b   : > { %419 = vst [vmem:[%s2262_s13 + $0x120] sm:$0xff] %v418_v36 }
  0x3c   : > { %421 = vst [vmem:[%s2262_s13 + $0x128] sm:$0xff] %v420_v37 }
  0x3d   : > { %423 = vst [vmem:[%s2262_s13 + $0x130] sm:$0xff] %v422_v38 }
  0x3e   : > { %425 = vst [vmem:[%s2262_s13 + $0x138] sm:$0xff] %v424_v39 }
  0x3f   : > { %427 = vst [vmem:[%s2262_s13 + $0x140] sm:$0xff] %v426_v40 }
  0x40   : > { %429 = vst [vmem:[%s2262_s13 + $0x148] sm:$0xff] %v428_v41 }
  0x41   : > { %431 = vst [vmem:[%s2262_s13 + $0x150] sm:$0xff] %v430_v42 }
  0x42   : > { %433 = vst [vmem:[%s2262_s13 + $0x158] sm:$0xff] %v432_v43 }
  0x43   : > { %435 = vst [vmem:[%s2262_s13 + $0x160] sm:$0xff] %v434_v44 }
  0x44   : > { %437 = vst [vmem:[%s2262_s13 + $0x168] sm:$0xff] %v436_v45 }
  0x45   : > { %439 = vst [vmem:[%s2262_s13 + $0x170] sm:$0xff] %v438_v46 }
  0x46   : > { %441 = vst [vmem:[%s2262_s13 + $0x178] sm:$0xff] %v440_v47 }
  0x47   : > { %443 = vst [vmem:[%s2262_s13 + $0x180] sm:$0xff] %v442_v48 }
  0x48   : > { %445 = vst [vmem:[%s2262_s13 + $0x188] sm:$0xff] %v444_v49 }
  0x49   : > { %447 = vst [vmem:[%s2262_s13 + $0x190] sm:$0xff] %v446_v50 }
  0x4a   : > { %449 = vst [vmem:[%s2262_s13 + $0x198] sm:$0xff] %v448_v51 }
  0x4b   : > { %451 = vst [vmem:[%s2262_s13 + $0x1a0] sm:$0xff] %v450_v52 }
  0x4c   : > { %453 = vst [vmem:[%s2262_s13 + $0x1a8] sm:$0xff] %v452_v53 }
  0x4d   : > { %455 = vst [vmem:[%s2262_s13 + $0x1b0] sm:$0xff] %v454_v54 }
  0x4e   : > { %457 = vst [vmem:[%s2262_s13 + $0x1b8] sm:$0xff] %v456_v55 }
  0x4f PF: > { %p1995_p11 = scmp.ge.s32.totalorder %s2159_s23, 1  ;;  %p462_p12 = scmp.lt.s32.totalorder %s2159_s23, 3 }
  0x51   : > { %p463_p13 = pnand %p1995_p11, %p462_p12 }
  0x53   : > { %466 = sbr.rel (%p463_p13) target bundleno = 768 (0x300), region = 74 }
  0x58   : > { %v556_v56 = vld [vmem:[%s3308_s2 + $0x20] sm:$0xff]  ;;  %v554_v57 = vld [vmem:[%s3308_s2 + $0x10] sm:$0xff]  ;;  %v2161_v59 = vmov 0   ;;  %v557_v60 = vld [vmem:[%s3308_s2 + $0x28] sm:$0xff]  ;;  %s2718_s17 = sand.u32 1, %s2143_s19   ;;  %vm1552_vm0 = vcmask 523264  }
  0x59   : > { %v552_v58 = vld [vmem:[%s3308_s2] sm:$0xff]  ;;  %2080 = vset.pattern.permute.xlu2 %v2161_v59  ;;  %2079 = vset.pattern.permute.xlu1 %v2161_v59  ;;  %v555_v61 = vld [vmem:[%s3308_s2 + $0x18] sm:$0xff]  ;;  %v553_v62 = vld [vmem:[%s3308_s2 + $0x8] sm:$0xff]  ;;  %s2018_s9 = smul.u32 448, %s2718_s17  ;;  %s1996_s27 = sshll.u32 %s2718_s17, 7 }
  0x5a   : > { %2078 = vset.pattern.permute.xlu0 %v2161_v59  ;;  %630 = vperm.xlu2 %2080, %v556_v56   ;;  %v560_v63 = vld [vmem:[%s3308_s2 + $0x40] sm:$0xff]  ;;  %v559_v0 = vld [vmem:[%s3308_s2 + $0x38] sm:$0xff]  ;;  %v558_v1 = vld [vmem:[%s3308_s2 + $0x30] sm:$0xff]  ;;  %s3249_s29 = scalar_lea.vmem [#allocation3], %s1996_s27  ;;  %s2014_s7 = sshll.u32 %s2151_s21, 3 }
  0x5b   : > { %620 = vperm.xlu1 %2079, %v554_v57   ;;  %610 = vperm.xlu0 %2078, %v552_v58   ;;  %v563_v2 = vld [vmem:[%s3308_s2 + $0x58] sm:$0xff]  ;;  %v562_v3 = vld [vmem:[%s3308_s2 + $0x50] sm:$0xff]  ;;  %v561_v4 = vld [vmem:[%s3308_s2 + $0x48] sm:$0xff]  ;;  %s2739_s12 = scalar_lea.vmem [#allocation2], %s2018_s9  ;;  %s1907_s10 = sshll.u32 %s3249_s29, 4  ;;  %s1908_s10 = int_to_ptr.vmem [resolvable:$true] %s1907_s10 }
  0x5c   : > { %v566_v5 = vld [vmem:[%s3308_s2 + $0x70] sm:$0xff]  ;;  %v565_v6 = vld [vmem:[%s3308_s2 + $0x68] sm:$0xff]  ;;  %v564_v7 = vld [vmem:[%s3308_s2 + $0x60] sm:$0xff]  ;;  %s1894_s21 = scalar_lea.sflag [#allocation4], %s2718_s17  ;;  %s2101_s24 = scalar_lea.hbm %s3311_s5, 256 }
  0x5d   : > { %v569_v8 = vld [vmem:[%s3308_s2 + $0x88] sm:$0xff]  ;;  %v568_v9 = vld [vmem:[%s3308_s2 + $0x80] sm:$0xff]  ;;  %v567_v10 = vld [vmem:[%s3308_s2 + $0x78] sm:$0xff] }
  0x5e   : > { %v572_v11 = vld [vmem:[%s3308_s2 + $0xa0] sm:$0xff]  ;;  %v571_v12 = vld [vmem:[%s3308_s2 + $0x98] sm:$0xff]  ;;  %v570_v13 = vld [vmem:[%s3308_s2 + $0x90] sm:$0xff] }
  0x5f   : > { %v575_v14 = vld [vmem:[%s3308_s2 + $0xb8] sm:$0xff]  ;;  %v574_v15 = vld [vmem:[%s3308_s2 + $0xb0] sm:$0xff]  ;;  %v573_v16 = vld [vmem:[%s3308_s2 + $0xa8] sm:$0xff] }
  0x60   : > { %v578_v17 = vld [vmem:[%s3308_s2 + $0xd0] sm:$0xff]  ;;  %v577_v18 = vld [vmem:[%s3308_s2 + $0xc8] sm:$0xff]  ;;  %v576_v19 = vld [vmem:[%s3308_s2 + $0xc0] sm:$0xff] }
  0x61   : > { %v581_v20 = vld [vmem:[%s3308_s2 + $0xe8] sm:$0xff]  ;;  %v580_v21 = vld [vmem:[%s3308_s2 + $0xe0] sm:$0xff]  ;;  %v579_v22 = vld [vmem:[%s3308_s2 + $0xd8] sm:$0xff] }
  0x62   : > { %635 = vperm.xlu2 %2080, %v557_v60   ;;  %v584_v23 = vld [vmem:[%s3308_s2 + $0x100] sm:$0xff]  ;;  %v583_v24 = vld [vmem:[%s3308_s2 + $0xf8] sm:$0xff]  ;;  %v582_v25 = vld [vmem:[%s3308_s2 + $0xf0] sm:$0xff] }
  0x63   : > { %625 = vperm.xlu1 %2079, %v555_v61   ;;  %615 = vperm.xlu0 %2078, %v553_v62   ;;  %v587_v26 = vld [vmem:[%s3308_s2 + $0x118] sm:$0xff]  ;;  %v586_v27 = vld [vmem:[%s3308_s2 + $0x110] sm:$0xff]  ;;  %v585_v28 = vld [vmem:[%s3308_s2 + $0x108] sm:$0xff] }
  0x64   : > { %v590_v30 = vld [vmem:[%s3308_s2 + $0x130] sm:$0xff]  ;;  %v589_v31 = vld [vmem:[%s3308_s2 + $0x128] sm:$0xff]  ;;  %v588_v32 = vld [vmem:[%s3308_s2 + $0x120] sm:$0xff] }
  0x65   : > { %v593_v34 = vld [vmem:[%s3308_s2 + $0x148] sm:$0xff]  ;;  %v592_v35 = vld [vmem:[%s3308_s2 + $0x140] sm:$0xff]  ;;  %v591_v36 = vld [vmem:[%s3308_s2 + $0x138] sm:$0xff] }
  0x66   : > { %v596_v38 = vld [vmem:[%s3308_s2 + $0x160] sm:$0xff]  ;;  %v595_v39 = vld [vmem:[%s3308_s2 + $0x158] sm:$0xff]  ;;  %v594_v40 = vld [vmem:[%s3308_s2 + $0x150] sm:$0xff] }
  0x67   : > { %v599_v44 = vld [vmem:[%s3308_s2 + $0x178] sm:$0xff]  ;;  %v598_v45 = vld [vmem:[%s3308_s2 + $0x170] sm:$0xff]  ;;  %v597_v46 = vld [vmem:[%s3308_s2 + $0x168] sm:$0xff] }
  0x68   : > { %v602_v50 = vld [vmem:[%s3308_s2 + $0x190] sm:$0xff]  ;;  %v601_v51 = vld [vmem:[%s3308_s2 + $0x188] sm:$0xff]  ;;  %v600_v52 = vld [vmem:[%s3308_s2 + $0x180] sm:$0xff] }
  0x69   : > { %v605_v56 = vld [vmem:[%s3308_s2 + $0x1a8] sm:$0xff]  ;;  %v604_v57 = vld [vmem:[%s3308_s2 + $0x1a0] sm:$0xff]  ;;  %v603_v58 = vld [vmem:[%s3308_s2 + $0x198] sm:$0xff] }
  0x6a   : > { %650 = vperm.xlu2 %2080, %v560_v63   ;;  %v944_v62 = vld [vmem:[%s3309_s3] sm:$0xff]  ;;  %v607_v63 = vld [vmem:[%s3308_s2 + $0x1b8] sm:$0xff] }
  0x6b   : > { %645 = vperm.xlu1 %2079, %v559_v0   ;;  %640 = vperm.xlu0 %2078, %v558_v1   ;;  %v606_v0 = vld [vmem:[%s3308_s2 + $0x1b0] sm:$0xff] }
  0x72   : > { %665 = vperm.xlu2 %2080, %v563_v2  }
  0x73   : > { %660 = vperm.xlu1 %2079, %v562_v3   ;;  %655 = vperm.xlu0 %2078, %v561_v4   ;;  %v947_v4 = vld [vmem:[%s3309_s3 + $0x18] sm:$0xff] }
  0x7a   : > { %680 = vperm.xlu2 %2080, %v566_v5   ;;  %v946_v5 = vld [vmem:[%s3309_s3 + $0x10] sm:$0xff] }
  0x7b   : > { %675 = vperm.xlu1 %2079, %v565_v6   ;;  %670 = vperm.xlu0 %2078, %v564_v7   ;;  %v945_v6 = vld [vmem:[%s3309_s3 + $0x8] sm:$0xff] }
  0x82   : > { %695 = vperm.xlu2 %2080, %v569_v8  }
  0x83   : > { %690 = vperm.xlu1 %2079, %v568_v9   ;;  %685 = vperm.xlu0 %2078, %v567_v10   ;;  %v950_v10 = vld [vmem:[%s3309_s3 + $0x30] sm:$0xff] }
  0x8a   : > { %710 = vperm.xlu2 %2080, %v572_v11   ;;  %v949_v11 = vld [vmem:[%s3309_s3 + $0x28] sm:$0xff] }
  0x8b   : > { %705 = vperm.xlu1 %2079, %v571_v12   ;;  %700 = vperm.xlu0 %2078, %v570_v13   ;;  %v948_v12 = vld [vmem:[%s3309_s3 + $0x20] sm:$0xff] }
  0x92   : > { %725 = vperm.xlu2 %2080, %v575_v14  }
  0x93   : > { %720 = vperm.xlu1 %2079, %v574_v15   ;;  %715 = vperm.xlu0 %2078, %v573_v16   ;;  %v953_v16 = vld [vmem:[%s3309_s3 + $0x48] sm:$0xff] }
  0x9a   : > { %740 = vperm.xlu2 %2080, %v578_v17   ;;  %v952_v17 = vld [vmem:[%s3309_s3 + $0x40] sm:$0xff] }
  0x9b   : > { %735 = vperm.xlu1 %2079, %v577_v18   ;;  %730 = vperm.xlu0 %2078, %v576_v19   ;;  %v951_v18 = vld [vmem:[%s3309_s3 + $0x38] sm:$0xff] }
  0xa2   : > { %755 = vperm.xlu2 %2080, %v581_v20  }
  0xa3   : > { %750 = vperm.xlu1 %2079, %v580_v21   ;;  %745 = vperm.xlu0 %2078, %v579_v22   ;;  %v956_v22 = vld [vmem:[%s3309_s3 + $0x60] sm:$0xff] }
  0xaa   : > { %770 = vperm.xlu2 %2080, %v584_v23   ;;  %v955_v23 = vld [vmem:[%s3309_s3 + $0x58] sm:$0xff] }
  0xab   : > { %765 = vperm.xlu1 %2079, %v583_v24   ;;  %760 = vperm.xlu0 %2078, %v582_v25   ;;  %v954_v24 = vld [vmem:[%s3309_s3 + $0x50] sm:$0xff] }
  0xb2   : > { %785 = vperm.xlu2 %2080, %v587_v26  }
  0xb3   : > { %780 = vperm.xlu1 %2079, %v586_v27   ;;  %775 = vperm.xlu0 %2078, %v585_v28   ;;  %v959_v28 = vld [vmem:[%s3309_s3 + $0x78] sm:$0xff] }
  0xb4   : > { %v2483_v29 = vpop.permute.xlu2 %630 }
  0xba   : > { %800 = vperm.xlu2 %2080, %v590_v30   ;;  %v958_v30 = vld [vmem:[%s3309_s3 + $0x70] sm:$0xff] }
  0xbb   : > { %795 = vperm.xlu1 %2079, %v589_v31   ;;  %790 = vperm.xlu0 %2078, %v588_v32   ;;  %v957_v31 = vld [vmem:[%s3309_s3 + $0x68] sm:$0xff] }
  0xbc   : > { %v2494_v33 = vpop.permute.xlu2 %635 }
  0xc2   : > { %815 = vperm.xlu2 %2080, %v593_v34  }
  0xc3   : > { %810 = vperm.xlu1 %2079, %v592_v35   ;;  %805 = vperm.xlu0 %2078, %v591_v36   ;;  %v990_v36 = vld [vmem:[%s3309_s3 + $0x170] sm:$0xff] }
  0xc4   : > { %v2505_v37 = vpop.permute.xlu2 %650 }
  0xca   : > { %830 = vperm.xlu2 %2080, %v596_v38   ;;  %v991_v38 = vld [vmem:[%s3309_s3 + $0x178] sm:$0xff] }
  0xcb   : > { %825 = vperm.xlu1 %2079, %v595_v39   ;;  %820 = vperm.xlu0 %2078, %v594_v40   ;;  %v960_v39 = vld [vmem:[%s3309_s3 + $0x80] sm:$0xff] }
  0xcc   : > { %v2516_v41 = vpop.permute.xlu2 %665 }
  0xcd   : > { %v2518_v42 = vpop.permute.xlu1 %620  ;;  %v2520_v43 = vpop.permute.xlu0 %610 }
  0xd2   : > { %845 = vperm.xlu2 %2080, %v599_v44  }
  0xd3   : > { %840 = vperm.xlu1 %2079, %v598_v45   ;;  %835 = vperm.xlu0 %2078, %v597_v46   ;;  %v974_v46 = vld [vmem:[%s3309_s3 + $0xf0] sm:$0xff] }
  0xd4   : > { %v2531_v47 = vpop.permute.xlu2 %680 }
  0xd5   : > { %v2533_v48 = vpop.permute.xlu1 %625  ;;  %v2535_v49 = vpop.permute.xlu0 %615 }
  0xda   : > { %860 = vperm.xlu2 %2080, %v602_v50   ;;  %v989_v50 = vld [vmem:[%s3309_s3 + $0x168] sm:$0xff] }
  0xdb   : > { %855 = vperm.xlu1 %2079, %v601_v51   ;;  %850 = vperm.xlu0 %2078, %v600_v52   ;;  %v975_v51 = vld [vmem:[%s3309_s3 + $0xf8] sm:$0xff] }
  0xdc   : > { %v2546_v53 = vpop.permute.xlu2 %695 }
  0xdd   : > { %3314 = vst [vmem:[#allocation6_spill] sm:$0xff] %v2546_v53  ;;  %v2548_v54 = vpop.permute.xlu1 %645  ;;  %v2550_v55 = vpop.permute.xlu0 %640 }
  0xe2   : > { %875 = vperm.xlu2 %2080, %v605_v56  }
  0xe3   : > { %870 = vperm.xlu1 %2079, %v604_v57   ;;  %865 = vperm.xlu0 %2078, %v603_v58   ;;  %v987_v58 = vld [vmem:[%s3309_s3 + $0x158] sm:$0xff] }
  0xe4   : > { %v2561_v59 = vpop.permute.xlu2 %710 }
  0xe5   : > { %3315 = vst [vmem:[#allocation7_spill] sm:$0xff] %v2561_v59  ;;  %v2563_v60 = vpop.permute.xlu1 %660  ;;  %v2565_v61 = vpop.permute.xlu0 %655 }
  0xea   : > { %1002 = vperm.xlu2 %2080, %v944_v62   ;;  %v973_v62 = vld [vmem:[%s3309_s3 + $0xe8] sm:$0xff] }
  0xeb   : > { %885 = vperm.xlu1 %2079, %v607_v63   ;;  %880 = vperm.xlu0 %2078, %v606_v0   ;;  %v988_v63 = vld [vmem:[%s3309_s3 + $0x160] sm:$0xff] }
  0xec   : > { %v2576_v1 = vpop.permute.xlu2 %725 }
  0xed   : > { %v2578_v2 = vpop.permute.xlu1 %675  ;;  %v2580_v3 = vpop.permute.xlu0 %670 }
  0xf2   : > { %1017 = vperm.xlu2 %2080, %v947_v4  }
  0xf3   : > { %1012 = vperm.xlu1 %2079, %v946_v5   ;;  %1007 = vperm.xlu0 %2078, %v945_v6   ;;  %v971_v6 = vld [vmem:[%s3309_s3 + $0xd8] sm:$0xff] }
  0xf4   : > { %v2591_v7 = vpop.permute.xlu2 %740 }
  0xf5   : > { %v2593_v8 = vpop.permute.xlu1 %690  ;;  %v2595_v9 = vpop.permute.xlu0 %685 }
  0xfa   : > { %1032 = vperm.xlu2 %2080, %v950_v10   ;;  %v986_v10 = vld [vmem:[%s3309_s3 + $0x150] sm:$0xff] }
  0xfb   : > { %1027 = vperm.xlu1 %2079, %v949_v11   ;;  %1022 = vperm.xlu0 %2078, %v948_v12   ;;  %v972_v11 = vld [vmem:[%s3309_s3 + $0xe0] sm:$0xff] }
  0xfc   : > { %v2606_v13 = vpop.permute.xlu2 %755 }
  0xfd   : > { %v2608_v14 = vpop.permute.xlu1 %705  ;;  %v2610_v15 = vpop.permute.xlu0 %700 }
  0xfe   : > { %3316 = vst [vmem:[#allocation8_spill] sm:$0xff] %v2608_v14 }
  0xff   : > { %3317 = vst [vmem:[#allocation9_spill] sm:$0xff] %v2610_v15  ;;  %v507_v15 = vld [vmem:[%s2739_s12 + $0x58] sm:$0xff] }
 0x102   : > { %1047 = vperm.xlu2 %2080, %v953_v16  }
 0x103   : > { %1042 = vperm.xlu1 %2079, %v952_v17   ;;  %1037 = vperm.xlu0 %2078, %v951_v18   ;;  %v984_v18 = vld [vmem:[%s3309_s3 + $0x140] sm:$0xff] }
 0x104   : > { %v2621_v19 = vpop.permute.xlu2 %770 }
 0x105   : > { %3318 = vst [vmem:[#allocation10_spill] sm:$0xff] %v2621_v19  ;;  %v2623_v20 = vpop.permute.xlu1 %720  ;;  %v2625_v21 = vpop.permute.xlu0 %715  ;;  %v995_v19 = vld [vmem:[%s3309_s3 + $0x198] sm:$0xff] }
 0x106   : > { %3319 = vst [vmem:[#allocation11_spill] sm:$0xff] %v2623_v20 }
 0x107   : > { %3320 = vst [vmem:[#allocation12_spill] sm:$0xff] %v2625_v21 }
 0x10a   : > { %1062 = vperm.xlu2 %2080, %v956_v22   ;;  %v970_v22 = vld [vmem:[%s3309_s3 + $0xd0] sm:$0xff] }
 0x10b   : > { %1057 = vperm.xlu1 %2079, %v955_v23   ;;  %1052 = vperm.xlu0 %2078, %v954_v24   ;;  %v985_v23 = vld [vmem:[%s3309_s3 + $0x148] sm:$0xff] }
 0x10c   : > { %v2636_v25 = vpop.permute.xlu2 %785 }
 0x10d   : > { %3321 = vst [vmem:[#allocation13_spill] sm:$0xff] %v2636_v25  ;;  %v2638_v26 = vpop.permute.xlu1 %735  ;;  %v2640_v27 = vpop.permute.xlu0 %730  ;;  %v992_v25 = vld [vmem:[%s3309_s3 + $0x180] sm:$0xff] }
 0x112   : > { %1077 = vperm.xlu2 %2080, %v959_v28  }
 0x113   : > { %1072 = vperm.xlu1 %2079, %v958_v30   ;;  %1067 = vperm.xlu0 %2078, %v957_v31   ;;  %v968_v31 = vld [vmem:[%s3309_s3 + $0xc0] sm:$0xff] }
 0x114   : > { %v2651_v32 = vpop.permute.xlu2 %800 }
 0x115   : > { %3322 = vst [vmem:[#allocation14_spill] sm:$0xff] %v2651_v32  ;;  %v2653_v34 = vpop.permute.xlu1 %750  ;;  %v2655_v35 = vpop.permute.xlu0 %745  ;;  %v506_v32 = vld [vmem:[%s2739_s12 + $0x50] sm:$0xff] }
 0x11a   : > { %1232 = vperm.xlu2 %2080, %v990_v36   ;;  %v496_v36 = vld [vmem:[%s2739_s12] sm:$0xff] }
 0x11b   : > { %1237 = vperm.xlu1 %2079, %v991_v38   ;;  %1082 = vperm.xlu0 %2078, %v960_v39   ;;  %v983_v38 = vld [vmem:[%s3309_s3 + $0x138] sm:$0xff]  ;;  %v969_v39 = vld [vmem:[%s3309_s3 + $0xc8] sm:$0xff] }
 0x11c   : > { %v2666_v40 = vpop.permute.xlu2 %815 }
 0x11d   : > { %v2668_v44 = vpop.permute.xlu1 %765  ;;  %v2670_v45 = vpop.permute.xlu0 %760 }
 0x122   : > { %1152 = vperm.xlu2 %2080, %v974_v46   ;;  %v888_v46 = vmul.f32 %v2520_v43, %v496_v36  ;;  %v982_v43 = vld [vmem:[%s3309_s3 + $0x130] sm:$0xff] }
 0x123   : > { %1227 = vperm.xlu1 %2079, %v989_v50   ;;  %1157 = vperm.xlu0 %2078, %v975_v51   ;;  %v966_v36 = vld [vmem:[%s3309_s3 + $0xb0] sm:$0xff] }
 0x124   : > { %v2681_v52 = vpop.permute.xlu2 %830 }
 0x125   : > { %v2683_v56 = vpop.permute.xlu1 %780  ;;  %v2685_v57 = vpop.permute.xlu0 %775 }
 0x126   : > { %3323 = vst [vmem:[#allocation15_spill] sm:$0xff] %v2683_v56  ;;  %v962_v56 = vld [vmem:[%s3309_s3 + $0x90] sm:$0xff] }
 0x127   : > { %3324 = vst [vmem:[#allocation16_spill] sm:$0xff] %v2685_v57 }
 0x12a   : > { %1217 = vperm.xlu2 %2080, %v987_v58  }
 0x12b   : > { %1147 = vperm.xlu1 %2079, %v973_v62   ;;  %1222 = vperm.xlu0 %2078, %v988_v63   ;;  %v967_v63 = vld [vmem:[%s3309_s3 + $0xb8] sm:$0xff] }
 0x12c   : > { %v2696_v0 = vpop.permute.xlu2 %845 }
 0x12d   : > { %v2698_v4 = vpop.permute.xlu1 %795  ;;  %v2700_v5 = vpop.permute.xlu0 %790 }
 0x12e   : > { %3325 = vst [vmem:[#allocation17_spill] sm:$0xff] %v2698_v4 }
 0x12f   : > { %3326 = vst [vmem:[#allocation18_spill] sm:$0xff] %v2700_v5 }
 0x132   : > { %1137 = vperm.xlu2 %2080, %v971_v6   ;;  %v499_v6 = vld [vmem:[%s2739_s12 + $0x18] sm:$0xff] }
 0x133   : > { %1212 = vperm.xlu1 %2079, %v986_v10   ;;  %1142 = vperm.xlu0 %2078, %v972_v11   ;;  %v999_v10 = vld [vmem:[%s3309_s3 + $0x1b8] sm:$0xff]  ;;  %v891_v11 = vmul.f32 %v2533_v48, %v499_v6  ;;  %v981_v48 = vld [vmem:[%s3309_s3 + $0x128] sm:$0xff] }
 0x134   : > { %v2711_v12 = vpop.permute.xlu2 %860 }
 0x135   : > { %3327 = vst [vmem:[#allocation19_spill] sm:$0xff] %v2711_v12  ;;  %v2713_v16 = vpop.permute.xlu1 %810  ;;  %v2715_v17 = vpop.permute.xlu0 %805 }
 0x13a   : > { %1202 = vperm.xlu2 %2080, %v984_v18  }
 0x13b   : > { %1132 = vperm.xlu1 %2079, %v970_v22   ;;  %1207 = vperm.xlu0 %2078, %v985_v23  }
 0x13c   : > { %v2730_v24 = vpop.permute.xlu2 %875 }
 0x13d   : > { %3328 = vst [vmem:[#allocation20_spill] sm:$0xff] %v2730_v24  ;;  %v2732_v28 = vpop.permute.xlu1 %825  ;;  %v2734_v30 = vpop.permute.xlu0 %820 }
 0x142   : > { %1122 = vperm.xlu2 %2080, %v968_v31  }
 0x143   : > { %1197 = vperm.xlu1 %2079, %v983_v38   ;;  %1127 = vperm.xlu0 %2078, %v969_v39   ;;  %v502_v38 = vld [vmem:[%s2739_s12 + $0x30] sm:$0xff] }
 0x144   : > { %v1003_v50 = vpop.permute.xlu2 %1002  ;;  %v998_v39 = vld [vmem:[%s3309_s3 + $0x1b0] sm:$0xff] }
 0x145   : > { %v2749_v51 = vadd.f32 %v1003_v50, %v888_v46  ;;  %v2751_v58 = vpop.permute.xlu1 %840  ;;  %v2753_v62 = vpop.permute.xlu0 %835  ;;  %v894_v46 = vmul.f32 %v2550_v55, %v502_v38  ;;  %v980_v55 = vld [vmem:[%s3309_s3 + $0x120] sm:$0xff] }
 0x14a   : > { %1117 = vperm.xlu2 %2080, %v967_v63  }
 0x14b   : > { %1277 = vperm.xlu1 %2079, %v999_v10   ;;  %1192 = vperm.xlu0 %2078, %v982_v43   ;;  %v965_v43 = vld [vmem:[%s3309_s3 + $0xa8] sm:$0xff] }
 0x14c   : > { %v1018_v18 = vpop.permute.xlu2 %1017 }
 0x14d   : > { %v2766_v22 = vadd.f32 %v1018_v18, %v891_v11  ;;  %v2768_v23 = vpop.permute.xlu1 %855  ;;  %v2770_v31 = vpop.permute.xlu0 %850  ;;  %v997_v11 = vld [vmem:[%s3309_s3 + $0x1a8] sm:$0xff] }
 0x14e   : > { %3329 = vst [vmem:[#allocation21_spill] sm:$0xff] %v2768_v23 }
 0x14f   : > { %3330 = vst [vmem:[#allocation22_spill] sm:$0xff] %v2770_v31  ;;  %v511_v31 = vld [vmem:[%s2739_s12 + $0x78] sm:$0xff] }
 0x152   : > { %1112 = vperm.xlu2 %2080, %v966_v36  }
 0x153   : > { %1272 = vperm.xlu1 %2079, %v998_v39   ;;  %1187 = vperm.xlu0 %2078, %v981_v48   ;;  %v964_v39 = vld [vmem:[%s3309_s3 + $0xa0] sm:$0xff] }
 0x154   : > { %v1033_v50 = vpop.permute.xlu2 %1032  ;;  %v996_v48 = vld [vmem:[%s3309_s3 + $0x1a0] sm:$0xff] }
 0x155   : > { %v2783_v63 = vadd.f32 %v1033_v50, %v894_v46  ;;  %v2785_v6 = vpop.permute.xlu1 %870  ;;  %v2787_v10 = vpop.permute.xlu0 %865  ;;  %v979_v46 = vld [vmem:[%s3309_s3 + $0x118] sm:$0xff] }
 0x156   : > { %3331 = vst [vmem:[#allocation23_spill] sm:$0xff] %v2785_v6  ;;  %v994_v6 = vld [vmem:[%s3309_s3 + $0x190] sm:$0xff] }
 0x157   : > { %3332 = vst [vmem:[#allocation24_spill] sm:$0xff] %v2787_v10 }
 0x15a   : > { %1107 = vperm.xlu2 %2080, %v965_v43  }
 0x15b   : > { %1267 = vperm.xlu1 %2079, %v997_v11   ;;  %1182 = vperm.xlu0 %2078, %v980_v55   ;;  %v963_v55 = vld [vmem:[%s3309_s3 + $0x98] sm:$0xff] }
 0x15c   : > { %v2798_v18 = vpop.permute.xlu2 %1047 }
 0x15d   : > { %v2800_v36 = vpop.permute.xlu1 %885  ;;  %v2802_v38 = vpop.permute.xlu0 %880 }
 0x15e   : > { %3333 = vst [vmem:[#allocation25_spill] sm:$0xff] %v2800_v36 }
 0x15f   : > { %3334 = vst [vmem:[#allocation26_spill] sm:$0xff] %v2802_v38 }
 0x162   : > { %1102 = vperm.xlu2 %2080, %v964_v39   ;;  %v978_v39 = vld [vmem:[%s3309_s3 + $0x110] sm:$0xff] }
 0x163   : > { %1262 = vperm.xlu1 %2079, %v996_v48   ;;  %1177 = vperm.xlu0 %2078, %v979_v46   ;;  %v903_v48 = vmul.f32 %v2595_v9, %v511_v31  ;;  %v977_v9 = vld [vmem:[%s3309_s3 + $0x108] sm:$0xff] }
 0x164   : > { %v1063_v50 = vpop.permute.xlu2 %1062 }
 0x165   : > { %v2813_v43 = vpop.permute.xlu1 %1012  ;;  %v2815_v11 = vpop.permute.xlu0 %1007 }
 0x16a   : > { %1097 = vperm.xlu2 %2080, %v963_v55   ;;  %v961_v55 = vld [vmem:[%s3309_s3 + $0x88] sm:$0xff] }
 0x16b   : > { %1257 = vperm.xlu1 %2079, %v995_v19   ;;  %1172 = vperm.xlu0 %2078, %v978_v39  }
 0x16c   : > { %v1078_v46 = vpop.permute.xlu2 %1077 }
 0x16d   : > { %v2828_v23 = vpop.permute.xlu1 %1027  ;;  %v2830_v12 = vpop.permute.xlu0 %1022  ;;  %v1295_v57 = vadd.f32 %v1078_v46, %v903_v48  ;;  %v1457_v46 = vld [vmem:[%s3310_s4 + $0x8] sm:$0xff] }
 0x16f   : > { %v1351_v10 = vmax.f32 %v1295_v57, 0.0 }
 0x171   : > { %1601 = vmatpush.msra.mxu0 %v1351_v10  ;;  %v993_v10 = vld [vmem:[%s3309_s3 + $0x188] sm:$0xff] }
 0x172   : > { %1092 = vperm.xlu2 %2080, %v962_v56   ;;  %v976_v56 = vld [vmem:[%s3309_s3 + $0x100] sm:$0xff] }
 0x173   : > { %1252 = vperm.xlu1 %2079, %v994_v6   ;;  %1167 = vperm.xlu0 %2078, %v977_v9   ;;  %v1456_v9 = vld [vmem:[%s3310_s4] sm:$0xff] }
 0x174   : > { %v2841_v19 = vpop.permute.xlu2 %1232 }
 0x175   : > { %v2843_v57 = vpop.permute.xlu1 %1042  ;;  %v2845_v31 = vpop.permute.xlu0 %1037 }
 0x17a   : > { %1087 = vperm.xlu2 %2080, %v961_v55   ;;  %v510_v55 = vld [vmem:[%s2739_s12 + $0x70] sm:$0xff] }
 0x17b   : > { %1247 = vperm.xlu1 %2079, %v993_v10   ;;  %1162 = vperm.xlu0 %2078, %v976_v56   ;;  %v509_v10 = vld [vmem:[%s2739_s12 + $0x68] sm:$0xff]  ;;  %v508_v56 = vld [vmem:[%s2739_s12 + $0x60] sm:$0xff]  ;;  %v902_v53 = vmul.f32 %v2531_v47, %v510_v55 }
 0x17c   : > { %v2856_v6 = vpop.permute.xlu2 %1152  ;;  %v901_v24 = vmul.f32 %v2578_v2, %v509_v10  ;;  %v900_v14 = vmul.f32 %v2580_v3, %v508_v56  ;;  %v1460_v47 = vld [vmem:[%s3310_s4 + $0x20] sm:$0xff]  ;;  %v899_v2 = vmul.f32 %v2516_v41, %v507_v15  ;;  %v1459_v10 = vld [vmem:[%s3310_s4 + $0x18] sm:$0xff]  ;;  %v1458_v3 = vld [vmem:[%s3310_s4 + $0x10] sm:$0xff] }
 0x17d   : > { %v1058_v39 = vpop.permute.xlu1 %1057  ;;  %v1053_v48 = vpop.permute.xlu0 %1052  ;;  %v542_v56 = vld [vmem:[%s2739_s12 + $0x170] sm:$0xff] }
 0x17e   : > { %v1291_v59 = vadd.f32 %v1058_v39, %v899_v2 }
 0x182   : > { %1479 = vperm.xlu2 %2080, %v1457_v46  }
 0x183   : > { %1474 = vperm.xlu1 %2079, %v1456_v9   ;;  %1242 = vperm.xlu0 %2078, %v992_v25   ;;  %v505_v25 = vld [vmem:[%s2739_s12 + $0x48] sm:$0xff]  ;;  %v1292_v9 = vadd.f32 %v1063_v50, %v900_v14 }
 0x184   : > { %v2872_v5 = vpop.permute.xlu2 %1217  ;;  %v897_v14 = vmul.f32 %v2565_v61, %v505_v25 }
 0x185   : > { %v1073_v38 = vpop.permute.xlu1 %1072  ;;  %v1068_v4 = vpop.permute.xlu0 %1067 }
 0x186   : > { %v1294_v46 = vadd.f32 %v1073_v38, %v902_v53  ;;  %v1293_v36 = vadd.f32 %v1068_v4, %v901_v24  ;;  %v512_v53 = vld [vmem:[%s2739_s12 + $0x80] sm:$0xff]  ;;  %v543_v4 = vld [vmem:[%s2739_s12 + $0x178] sm:$0xff]  ;;  %v898_v38 = vmul.f32 %v2563_v60, %v506_v32 }
 0x187   : > { %v504_v24 = vld [vmem:[%s2739_s12 + $0x40] sm:$0xff]  ;;  %v904_v15 = vmul.f32 %v2593_v8, %v512_v53  ;;  %v935_v50 = vmul.f32 %v2696_v0, %v543_v4  ;;  %v503_v32 = vld [vmem:[%s2739_s12 + $0x38] sm:$0xff]  ;;  %v1347_v8 = vmax.f32 %v1291_v59, 0.0  ;;  %v1462_v59 = vld [vmem:[%s3310_s4 + $0x30] sm:$0xff] }
 0x188   : > { %v1350_v55 = vmax.f32 %v1294_v46, 0.0  ;;  %v1349_v41 = vmax.f32 %v1293_v36, 0.0  ;;  %v1348_v46 = vmax.f32 %v1292_v9, 0.0  ;;  %v1290_v21 = vadd.f32 %v1053_v48, %v898_v38  ;;  %v500_v4 = vld [vmem:[%s2739_s12 + $0x20] sm:$0xff] }
 0x189   : > { %v896_v60 = vmul.f32 %v2505_v37, %v504_v24  ;;  %v934_v36 = vmul.f32 %v2751_v58, %v542_v56  ;;  %v895_v37 = vmul.f32 %v2548_v54, %v503_v32  ;;  %v1461_v54 = vld [vmem:[%s3310_s4 + $0x28] sm:$0xff] }
 0x18a   : > { %1602 = vmatpush.msra.mxu0 %v1350_v55  ;;  %1494 = vperm.xlu2 %2080, %v1460_v47   ;;  %v1289_v47 = vadd.f32 %v2798_v18, %v897_v14  ;;  %v1346_v58 = vmax.f32 %v1290_v21, 0.0  ;;  %v1463_v18 = vld [vmem:[%s3310_s4 + $0x38] sm:$0xff] }
 0x18b   : > { %1489 = vperm.xlu1 %2079, %v1459_v10   ;;  %1484 = vperm.xlu0 %2078, %v1458_v3   ;;  %v1326_v2 = vadd.f32 %v2841_v19, %v934_v36  ;;  %v1288_v25 = vadd.f32 %v2843_v57, %v896_v60  ;;  %v527_v55 = vld [vmem:[%s2739_s12 + $0xf8] sm:$0xff]  ;;  %v541_v10 = vld [vmem:[%s2739_s12 + $0x168] sm:$0xff]  ;;  %v526_v57 = vld [vmem:[%s2739_s12 + $0xf0] sm:$0xff]  ;;  %v1287_v3 = vadd.f32 %v2845_v31, %v895_v37 }
 0x18c   : > { %1603 = vmatpush.msra.mxu0 %v1349_v41  ;;  %v2896_v20 = vpop.permute.xlu2 %1137  ;;  %v501_v19 = vld [vmem:[%s2739_s12 + $0x28] sm:$0xff]  ;;  %v1345_v21 = vmax.f32 %v1289_v47, 0.0  ;;  %v919_v24 = vmul.f32 %v2668_v44, %v527_v55  ;;  %v933_v38 = vmul.f32 %v2753_v62, %v541_v10  ;;  %v918_v31 = vmul.f32 %v2670_v45, %v526_v57 }
 0x18d   : > { %v1238_v39 = vpop.permute.xlu1 %1237  ;;  %v1083_v61 = vpop.permute.xlu0 %1082  ;;  %v1382_v53 = vmax.f32 %v1326_v2, 0.0  ;;  %v1344_v56 = vmax.f32 %v1288_v25, 0.0  ;;  %v893_v14 = vmul.f32 %v2494_v33, %v501_v19  ;;  %v892_v62 = vmul.f32 %v2483_v29, %v500_v4  ;;  %v525_v33 = vld [vmem:[%s2739_s12 + $0xe8] sm:$0xff]  ;;  %v538_v4 = vld [vmem:[%s2739_s12 + $0x150] sm:$0xff] }
 0x18e   : > { %v2902_v0 = vadd.f32 %v1083_v61, %v904_v15  ;;  %1604 = vmatpush.msra.mxu0 %v1348_v46  ;;  %v1327_v48 = vadd.f32 %v1238_v39, %v935_v50  ;;  %v1343_v46 = vmax.f32 %v1287_v3, 0.0  ;;  %v1310_v36 = vadd.f32 %v2856_v6, %v918_v31  ;;  %v498_v39 = vld [vmem:[%s2739_s12 + $0x10] sm:$0xff]  ;;  %v1465_v29 = vld [vmem:[%s3310_s4 + $0x48] sm:$0xff] }
 0x18f   : > { %v1285_v32 = vadd.f32 %v2828_v23, %v893_v14  ;;  %v1342_v45 = vmax.f32 %v2783_v63, 0.0  ;;  %v1284_v2 = vadd.f32 %v2830_v12, %v892_v62  ;;  %v1464_v23 = vld [vmem:[%s3310_s4 + $0x40] sm:$0xff]  ;;  %v497_v6 = vld [vmem:[%s2739_s12 + $0x8] sm:$0xff]  ;;  %v539_v63 = vld [vmem:[%s2739_s12 + $0x158] sm:$0xff]  ;;  %v890_v37 = vmul.f32 %v2518_v42, %v498_v39 }
 0x190   : > { %1605 = vmatpush.msra.mxu0 %v1347_v8  ;;  %v1383_v9 = vmax.f32 %v1327_v48, 0.0  ;;  %v1466_v8 = vld [vmem:[%s3310_s4 + $0x50] sm:$0xff]  ;;  %v540_v48 = vld [vmem:[%s2739_s12 + $0x160] sm:$0xff]  ;;  %v917_v12 = vmul.f32 %v2606_v13, %v525_v33  ;;  %v931_v55 = vmul.f32 %v2732_v28, %v539_v63  ;;  %v1339_v57 = vmax.f32 %v2766_v22, 0.0  ;;  %v1467_v22 = vld [vmem:[%s3310_s4 + $0x58] sm:$0xff] }
 0x191   : > { %v1341_v25 = vmax.f32 %v1285_v32, 0.0  ;;  %v1282_v10 = vadd.f32 %v2813_v43, %v890_v37  ;;  %v1340_v42 = vmax.f32 %v1284_v2, 0.0  ;;  %v1469_v43 = vld [vmem:[%s3310_s4 + $0x68] sm:$0xff]  ;;  %v930_v31 = vmul.f32 %v2734_v30, %v538_v4 }
 0x192   : > { %1606 = vmatpush.msra.mxu0 %v1346_v58  ;;  %1731 = vmatpush.msra.mxu2 %v1383_v9  ;;  %v1366_v58 = vmax.f32 %v1310_v36, 0.0  ;;  %v932_v9 = vmul.f32 %v2681_v52, %v540_v48  ;;  %v1323_v3 = vadd.f32 %v2872_v5, %v931_v55  ;;  %v523_v5 = vld [vmem:[%s2739_s12 + $0xd8] sm:$0xff]  ;;  %v522_v36 = vld [vmem:[%s2739_s12 + $0xd0] sm:$0xff]  ;;  %v537_v39 = vld [vmem:[%s2739_s12 + $0x148] sm:$0xff] }
 0x193   : > { %1509 = vperm.xlu2 %2080, %v1463_v18   ;;  %1504 = vperm.xlu1 %2079, %v1462_v59   ;;  %v889_v59 = vmul.f32 %v2535_v49, %v497_v6  ;;  %v524_v49 = vld [vmem:[%s2739_s12 + $0xe0] sm:$0xff] }
 0x194   : > { %1499 = vperm.xlu0 %2078, %v1461_v54   ;;  %1607 = vmatpush.msra.mxu0 %v1345_v21  ;;  %v2924_v41 = vpop.permute.xlu2 %1202  ;;  %v916_v14 = vmul.f32 %v2653_v34, %v524_v49  ;;  %v1392_v34 = vld [vmem:[%s3307_s1] sm:$0xff] }
 0x195   : > { %1732 = vmatpush.msra.mxu2 %v1382_v53  ;;  %v1228_v15 = vpop.permute.xlu1 %1227  ;;  %v1158_v50 = vpop.permute.xlu0 %1157  ;;  %v1281_v21 = vadd.f32 %v2815_v11, %v889_v59  ;;  %v1396_v6 = vld [vmem:[%s3307_s1 + $0x20] sm:$0xff]  ;;  %v519_v59 = vld [vmem:[%s2739_s12 + $0xb8] sm:$0xff] }
 0x196   : > { %v1325_v60 = vadd.f32 %v1228_v15, %v933_v38  ;;  %1608 = vmatpush.msra.mxu0 %v1344_v56  ;;  %v1311_v44 = vadd.f32 %v1158_v50, %v919_v24  ;;  %v1338_v24 = vmax.f32 %v1282_v10, 0.0  ;;  %v1468_v38 = vld [vmem:[%s3310_s4 + $0x60] sm:$0xff]  ;;  %v1379_v56 = vmax.f32 %v1323_v3, 0.0 }
 0x197   : > { %v1337_v11 = vmax.f32 %v1281_v21, 0.0  ;;  %v915_v50 = vmul.f32 %v2655_v35, %v523_v5  ;;  %v516_v49 = vld [vmem:[%s2739_s12 + $0xa0] sm:$0xff] }
 0x198   : > { %v1381_v61 = vmax.f32 %v1325_v60, 0.0  ;;  %1609 = vmatpush.msra.mxu0 %v1343_v46  ;;  %v1367_v47 = vmax.f32 %v1311_v44, 0.0  ;;  %v1336_v46 = vmax.f32 %v2749_v51, 0.0  ;;  %v1471_v51 = vld [vmem:[%s3310_s4 + $0x78] sm:$0xff] }
 0x199   : > { %v1307_v30 = vadd.f32 %v2896_v20, %v915_v50  ;;  %v914_v20 = vmul.f32 %v2591_v7, %v522_v36  ;;  %v3339_v50 = vld [vmem:[#allocation25_spill] sm:$0xff] }
 0x19a   : > { %1610 = vmatpush.msra.mxu0 %v1342_v45  ;;  %1666 = vmatpush.msra.mxu1 %v1367_v47  ;;  %v536_v45 = vld [vmem:[%s2739_s12 + $0x140] sm:$0xff] }
 0x19b   : > { %1733 = vmatpush.msra.mxu2 %v1381_v61  ;;  %1524 = vperm.xlu2 %2080, %v1466_v8   ;;  %v1470_v61 = vld [vmem:[%s3310_s4 + $0x70] sm:$0xff]  ;;  %v1363_v47 = vmax.f32 %v1307_v30, 0.0  ;;  %v929_v8 = vmul.f32 %v2666_v40, %v537_v39  ;;  %v928_v48 = vmul.f32 %v2713_v16, %v536_v45  ;;  %v521_v16 = vld [vmem:[%s2739_s12 + $0xc8] sm:$0xff] }
 0x19c   : > { %1519 = vperm.xlu1 %2079, %v1465_v29   ;;  %1514 = vperm.xlu0 %2078, %v1464_v23   ;;  %v2950_v18 = vpop.permute.xlu2 %1122  ;;  %v913_v55 = vmul.f32 %v2638_v26, %v521_v16  ;;  %v1408_v16 = vld [vmem:[%s3307_s1 + $0x80] sm:$0xff] }
 0x19d   : > { %1611 = vmatpush.msra.mxu0 %v1341_v25  ;;  %1667 = vmatpush.msra.mxu1 %v1366_v58  ;;  %v1148_v54 = vpop.permute.xlu1 %1147  ;;  %v1223_v19 = vpop.permute.xlu0 %1222  ;;  %v1320_v7 = vadd.f32 %v2924_v41, %v928_v48  ;;  %v520_v58 = vld [vmem:[%s2739_s12 + $0xc0] sm:$0xff]  ;;  %v3340_v48 = vld [vmem:[#allocation8_spill] sm:$0xff] }
 0x19e   : > { %v1309_v13 = vadd.f32 %v1148_v54, %v917_v12  ;;  %v1324_v52 = vadd.f32 %v1223_v19, %v932_v9  ;;  %v535_v12 = vld [vmem:[%s2739_s12 + $0x138] sm:$0xff]  ;;  %v912_v10 = vmul.f32 %v2640_v27, %v520_v58  ;;  %v518_v54 = vld [vmem:[%s2739_s12 + $0xb0] sm:$0xff]  ;;  %v517_v27 = vld [vmem:[%s2739_s12 + $0xa8] sm:$0xff] }
 0x19f   : > { %1612 = vmatpush.msra.mxu0 %v1340_v42  ;;  %v1376_v9 = vmax.f32 %v1320_v7, 0.0  ;;  %v927_v41 = vmul.f32 %v2715_v17, %v535_v12  ;;  %v3335_v17 = vld [vmem:[#allocation11_spill] sm:$0xff] }
 0x1a0   : > { %v1365_v28 = vmax.f32 %v1309_v13, 0.0  ;;  %v1380_v53 = vmax.f32 %v1324_v52, 0.0  ;;  %v1400_v52 = vld [vmem:[%s3307_s1 + $0x40] sm:$0xff]  ;;  %v1304_v21 = vadd.f32 %v2950_v18, %v912_v10 }
 0x1a1   : > { %1613 = vmatpush.msra.mxu0 %v1339_v57  ;;  %v911_v57 = vmul.f32 %v2576_v1, %v519_v59  ;;  %v3337_v1 = vld [vmem:[#allocation7_spill] sm:$0xff]  ;;  %v514_v59 = vld [vmem:[%s2739_s12 + $0x90] sm:$0xff] }
 0x1a2   : > { %1668 = vmatpush.msra.mxu1 %v1365_v28  ;;  %1734 = vmatpush.msra.mxu2 %v1380_v53  ;;  %v910_v28 = vmul.f32 %v3335_v17, %v518_v54  ;;  %v908_v18 = vmul.f32 %v3337_v1, %v516_v49  ;;  %v3343_v54 = vld [vmem:[#allocation9_spill] sm:$0xff]  ;;  %v1412_v17 = vld [vmem:[%s3307_s1 + $0xa0] sm:$0xff] }
 0x1a3   : > { %1614 = vmatpush.msra.mxu0 %v1338_v24  ;;  %1539 = vperm.xlu2 %2080, %v1469_v43   ;;  %v534_v24 = vld [vmem:[%s2739_s12 + $0x130] sm:$0xff]  ;;  %v3347_v1 = vld [vmem:[#allocation13_spill] sm:$0xff] }
 0x1a4   : > { %1534 = vperm.xlu1 %2079, %v1468_v38   ;;  %1529 = vperm.xlu0 %2078, %v1467_v22   ;;  %v1118_v15 = vpop.permute.xlu2 %1117  ;;  %v551_v38 = vld [vmem:[%s2739_s12 + $0x1b8] sm:$0xff]  ;;  %v3336_v22 = vld [vmem:[#allocation12_spill] sm:$0xff] }
 0x1a5   : > { %1615 = vmatpush.msra.mxu0 %v1337_v11  ;;  %1735 = vmatpush.msra.mxu2 %v1379_v56  ;;  %v1213_v60 = vpop.permute.xlu1 %1212  ;;  %v1143_v44 = vpop.permute.xlu0 %1142  ;;  %v1303_v53 = vadd.f32 %v1118_v15, %v911_v57  ;;  %v909_v5 = vmul.f32 %v3336_v22, %v517_v27  ;;  %v1360_v11 = vmax.f32 %v1304_v21, 0.0  ;;  %v3345_v57 = vld [vmem:[#allocation20_spill] sm:$0xff]  ;;  %v531_v22 = vld [vmem:[%s2739_s12 + $0x118] sm:$0xff] }
 0x1a6   : > { %v1322_v62 = vadd.f32 %v1213_v60, %v930_v31  ;;  %v1308_v32 = vadd.f32 %v1143_v44, %v916_v14  ;;  %v3338_v14 = vld [vmem:[#allocation14_spill] sm:$0xff] }
 0x1a7   : > { %1616 = vmatpush.msra.mxu0 %v1336_v46  ;;  %v926_v31 = vmul.f32 %v3338_v14, %v534_v24  ;;  %v943_v46 = vmul.f32 %v3339_v50, %v551_v38  ;;  %v1359_v60 = vmax.f32 %v1303_v53, 0.0  ;;  %v3348_v14 = vld [vmem:[#allocation23_spill] sm:$0xff] }
 0x1a8   : > { %v1378_v33 = vmax.f32 %v1322_v62, 0.0  ;;  %v1364_v35 = vmax.f32 %v1308_v32, 0.0  ;;  %1617 = vmatmul.f32.vlgmr.msra.gmra.mxu0 %v1392_v34  ;;  %v1404_v32 = vld [vmem:[%s3307_s1 + $0x60] sm:$0xff] }
 0x1aa   : > { %1669 = vmatpush.msra.mxu1 %v1364_v35  ;;  %1736 = vmatpush.msra.mxu2 %v1378_v33  ;;  %v515_v35 = vld [vmem:[%s2739_s12 + $0x98] sm:$0xff] }
 0x1ac   : > { %1549 = vperm.xlu1 %2079, %v1471_v51   ;;  %1544 = vperm.xlu0 %2078, %v1470_v61   ;;  %v1113_v2 = vpop.permute.xlu2 %1112 }
 0x1ad   : > { %1670 = vmatpush.msra.mxu1 %v1363_v47  ;;  %v1133_v29 = vpop.permute.xlu1 %1132  ;;  %v1208_v23 = vpop.permute.xlu0 %1207  ;;  %v1302_v56 = vadd.f32 %v1113_v2, %v910_v28  ;;  %v533_v47 = vld [vmem:[%s2739_s12 + $0x128] sm:$0xff]  ;;  %v907_v2 = vmul.f32 %v3340_v48, %v515_v35  ;;  %v1352_v35 = vmax.f32 %v2902_v0, 0.0  ;;  %v1420_v0 = vld [vmem:[%s3307_s1 + $0xe0] sm:$0xff] }
 0x1ae   : > { %v1306_v63 = vadd.f32 %v1133_v29, %v914_v20  ;;  %v1321_v37 = vadd.f32 %v1208_v23, %v929_v8  ;;  %v550_v20 = vld [vmem:[%s2739_s12 + $0x1b0] sm:$0xff]  ;;  %v3341_v29 = vld [vmem:[#allocation17_spill] sm:$0xff] }
 0x1af   : > { %v1358_v30 = vmax.f32 %v1302_v56, 0.0  ;;  %v925_v23 = vmul.f32 %v3341_v29, %v533_v47  ;;  %v3350_v47 = vld [vmem:[#allocation24_spill] sm:$0xff] }
 0x1b0   : > { %v1362_v40 = vmax.f32 %v1306_v63, 0.0  ;;  %v1377_v25 = vmax.f32 %v1321_v37, 0.0  ;;  %1620 = vmatmul.f32.gmra.mxu0 %v1396_v6  ;;  %v3342_v6 = vld [vmem:[#allocation26_spill] sm:$0xff] }
 0x1b1   : > { %v942_v7 = vmul.f32 %v3342_v6, %v550_v20 }
 0x1b2   : > { %1671 = vmatpush.msra.mxu1 %v1362_v40  ;;  %1737 = vmatpush.msra.mxu2 %v1377_v25 }
 0x1b4   : > { %1738 = vmatpush.msra.mxu2 %v1376_v9  ;;  %v1108_v42 = vpop.permute.xlu2 %1107 }
 0x1b5   : > { %v1198_v19 = vpop.permute.xlu1 %1197  ;;  %v1128_v13 = vpop.permute.xlu0 %1127  ;;  %v1301_v15 = vadd.f32 %v1108_v42, %v909_v5  ;;  %v549_v42 = vld [vmem:[%s2739_s12 + $0x1a8] sm:$0xff]  ;;  %v548_v5 = vld [vmem:[%s2739_s12 + $0x1a0] sm:$0xff] }
 0x1b6   : > { %v1319_v26 = vadd.f32 %v1198_v19, %v927_v41  ;;  %v1305_v3 = vadd.f32 %v1128_v13, %v913_v55  ;;  %v532_v41 = vld [vmem:[%s2739_s12 + $0x120] sm:$0xff]  ;;  %v906_v19 = vmul.f32 %v3343_v54, %v514_v59  ;;  %v941_v21 = vmul.f32 %v3345_v57, %v549_v42  ;;  %v545_v54 = vld [vmem:[%s2739_s12 + $0x188] sm:$0xff] }
 0x1b7   : > { %v1357_v45 = vmax.f32 %v1301_v15, 0.0  ;;  %v3344_v13 = vld [vmem:[#allocation18_spill] sm:$0xff] }
 0x1b8   : > { %v1375_v43 = vmax.f32 %v1319_v26, 0.0  ;;  %v1361_v4 = vmax.f32 %v1305_v3, 0.0  ;;  %1623 = vmatmul.f32.gmra.mxu0 %v1400_v52  ;;  %v924_v52 = vmul.f32 %v3344_v13, %v532_v41  ;;  %v1424_v59 = vld [vmem:[%s3307_s1 + $0x100] sm:$0xff] }
 0x1b9   : > { %v528_v13 = vld [vmem:[%s2739_s12 + $0x100] sm:$0xff] }
 0x1ba   : > { %1672 = vmatpush.msra.mxu1 %v1361_v4  ;;  %1739 = vmatpush.msra.mxu2 %v1375_v43  ;;  %v513_v4 = vld [vmem:[%s2739_s12 + $0x88] sm:$0xff] }
 0x1bc   : > { %1673 = vmatpush.msra.mxu1 %v1360_v11  ;;  %v1103_v44 = vpop.permute.xlu2 %1102  ;;  %v3346_v11 = vld [vmem:[#allocation6_spill] sm:$0xff] }
 0x1bd   : > { %v1278_v34 = vpop.permute.xlu1 %1277  ;;  %v1193_v62 = vpop.permute.xlu0 %1192  ;;  %v1300_v36 = vadd.f32 %v1103_v44, %v908_v18  ;;  %v905_v56 = vmul.f32 %v3346_v11, %v513_v4  ;;  %v923_v18 = vmul.f32 %v3347_v1, %v531_v22  ;;  %v1416_v44 = vld [vmem:[%s3307_s1 + $0xc0] sm:$0xff]  ;;  %v1394_v4 = vld [vmem:[%s3307_s1 + $0x10] sm:$0xff] }
 0x1be   : > { %v1318_v39 = vadd.f32 %v1193_v62, %v926_v31  ;;  %1674 = vmatpush.msra.mxu1 %v1359_v60  ;;  %v1335_v33 = vadd.f32 %v1278_v34, %v943_v46  ;;  %v940_v31 = vmul.f32 %v3348_v14, %v548_v5  ;;  %v3355_v22 = vld [vmem:[#allocation22_spill] sm:$0xff]  ;;  %v1398_v14 = vld [vmem:[%s3307_s1 + $0x30] sm:$0xff] }
 0x1bf   : > { %v1356_v8 = vmax.f32 %v1300_v36, 0.0  ;;  %v1432_v11 = vld [vmem:[%s3307_s1 + $0x140] sm:$0xff] }
 0x1c0   : > { %v1374_v51 = vmax.f32 %v1318_v39, 0.0  ;;  %1626 = vmatmul.f32.gmra.mxu0 %v1404_v32  ;;  %1675 = vmatpush.msra.mxu1 %v1358_v30  ;;  %v1391_v61 = vmax.f32 %v1335_v33, 0.0  ;;  %v530_v39 = vld [vmem:[%s2739_s12 + $0x110] sm:$0xff]  ;;  %v547_v33 = vld [vmem:[%s2739_s12 + $0x198] sm:$0xff] }
 0x1c1   : > { %v939_v20 = vmul.f32 %v3350_v47, %v547_v33  ;;  %v1407_v33 = vld [vmem:[%s3307_s1 + $0x78] sm:$0xff]  ;;  %v1425_v47 = vld [vmem:[%s3307_s1 + $0x108] sm:$0xff] }
 0x1c2   : > { %1676 = vmatpush.msra.mxu1 %v1357_v45  ;;  %1740 = vmatpush.msra.mxu2 %v1374_v51  ;;  %v1393_v45 = vld [vmem:[%s3307_s1 + $0x8] sm:$0xff] }
 0x1c3   : > { %1804 = vmatpush.msra.mxu3 %v1391_v61  ;;  %v3349_v51 = vld [vmem:[#allocation15_spill] sm:$0xff] }
 0x1c4   : > { %1677 = vmatpush.msra.mxu1 %v1356_v8  ;;  %v1098_v63 = vpop.permute.xlu2 %1097  ;;  %v922_v61 = vmul.f32 %v3349_v51, %v530_v39  ;;  %v1410_v39 = vld [vmem:[%s3307_s1 + $0x90] sm:$0xff] }
 0x1c5   : > { %v1299_v37 = vadd.f32 %v1098_v63, %v907_v2  ;;  %v1273_v40 = vpop.permute.xlu1 %1272  ;;  %v1188_v25 = vpop.permute.xlu0 %1187  ;;  %v546_v63 = vld [vmem:[%s2739_s12 + $0x190] sm:$0xff] }
 0x1c6   : > { %v1334_v58 = vadd.f32 %v1273_v40, %v942_v7  ;;  %v1317_v12 = vadd.f32 %v1188_v25, %v925_v23  ;;  %v529_v7 = vld [vmem:[%s2739_s12 + $0x108] sm:$0xff]  ;;  %v3351_v40 = vld [vmem:[#allocation16_spill] sm:$0xff] }
 0x1c7   : > { %v1355_v9 = vmax.f32 %v1299_v37, 0.0  ;;  %v1397_v37 = vld [vmem:[%s3307_s1 + $0x28] sm:$0xff]  ;;  %v921_v25 = vmul.f32 %v3351_v40, %v529_v7  ;;  %v1414_v51 = vld [vmem:[%s3307_s1 + $0xb0] sm:$0xff]  ;;  %v1423_v7 = vld [vmem:[%s3307_s1 + $0xf8] sm:$0xff] }
 0x1c8   : > { %v1390_v55 = vmax.f32 %v1334_v58, 0.0  ;;  %v1373_v10 = vmax.f32 %v1317_v12, 0.0  ;;  %1629 = vmatmul.f32.gmra.mxu0 %v1408_v16  ;;  %v3352_v16 = vld [vmem:[#allocation19_spill] sm:$0xff]  ;;  %v1427_v40 = vld [vmem:[%s3307_s1 + $0x118] sm:$0xff] }
 0x1c9   : > { %1678 = vmatpush.msra.mxu1 %v1355_v9  ;;  %v938_v58 = vmul.f32 %v3352_v16, %v546_v63  ;;  %v1437_v63 = vld [vmem:[%s3307_s1 + $0x168] sm:$0xff]  ;;  %v1434_v16 = vld [vmem:[%s3307_s1 + $0x150] sm:$0xff] }
 0x1ca   : > { %1741 = vmatpush.msra.mxu2 %v1373_v10  ;;  %1805 = vmatpush.msra.mxu3 %v1390_v55 }
 0x1cc   : > { %v1093_v26 = vpop.permute.xlu2 %1092 }
 0x1cd   : > { %v1298_v3 = vadd.f32 %v1093_v26, %v906_v19  ;;  %v1268_v27 = vpop.permute.xlu1 %1267  ;;  %v1183_v49 = vpop.permute.xlu0 %1182  ;;  %v1401_v19 = vld [vmem:[%s3307_s1 + $0x48] sm:$0xff] }
 0x1ce   : > { %v1333_v28 = vadd.f32 %v1268_v27, %v941_v21  ;;  %v1316_v53 = vadd.f32 %v1183_v49, %v924_v52  ;;  %v3353_v52 = vld [vmem:[#allocation21_spill] sm:$0xff]  ;;  %v3354_v21 = vld [vmem:[#allocation10_spill] sm:$0xff] }
 0x1cf   : > { %v1354_v43 = vmax.f32 %v1298_v3, 0.0  ;;  %v937_v57 = vmul.f32 %v3353_v52, %v545_v54  ;;  %v920_v26 = vmul.f32 %v3354_v21, %v528_v13  ;;  %v1428_v27 = vld [vmem:[%s3307_s1 + $0x120] sm:$0xff]  ;;  %v1443_v13 = vld [vmem:[%s3307_s1 + $0x198] sm:$0xff] }
 0x1d0   : > { %v1389_v24 = vmax.f32 %v1333_v28, 0.0  ;;  %v1372_v38 = vmax.f32 %v1316_v53, 0.0  ;;  %1632 = vmatmul.f32.gmra.mxu0 %v1412_v17  ;;  %v1447_v21 = vld [vmem:[%s3307_s1 + $0x1b8] sm:$0xff] }
 0x1d1   : > { %1679 = vmatpush.msra.mxu1 %v1354_v43 }
 0x1d2   : > { %1742 = vmatpush.msra.mxu2 %v1372_v38  ;;  %1806 = vmatpush.msra.mxu3 %v1389_v24  ;;  %v1405_v24 = vld [vmem:[%s3307_s1 + $0x68] sm:$0xff]  ;;  %v544_v38 = vld [vmem:[%s2739_s12 + $0x180] sm:$0xff]  ;;  %s1906_s12 = scalar_lea.hbm %s3311_s5, %s2014_s7 }
 0x1d3   : > { %v936_v5 = vmul.f32 %v3355_v22, %v544_v38  ;;  %s1909_s11 = sshll.u32 %s1906_s12, 4  ;;  %s1910_s11 = int_to_ptr.hbm [resolvable:$true] %s1909_s11 }
 0x1d4   : > { %v1088_v50 = vpop.permute.xlu2 %1087  ;;  %s2095_s13 = sshra.s32 %s1910_s11, 4  ;;  %s2096_s13 = int_to_ptr.hbm [resolvable:$true] %s2095_s13 }
 0x1d5   : > { %v1297_v46 = vadd.f32 %v1088_v50, %v905_v56  ;;  %v1263_v60 = vpop.permute.xlu1 %1262  ;;  %v1178_v15 = vpop.permute.xlu0 %1177  ;;  %v1409_v50 = vld [vmem:[%s3307_s1 + $0x88] sm:$0xff]  ;;  %s2097_s14 = scalar_lea.hbm %s2096_s13, 128  ;;  %p2102_p3 = scmp.lt.s32.totalorder %s2096_s13, %s3311_s5 }
 0x1d6   : > { %v1332_v34 = vadd.f32 %v1263_v60, %v940_v31  ;;  %v1315_v62 = vadd.f32 %v1178_v15, %v923_v18  ;;  %v1395_v31 = vld [vmem:[%s3307_s1 + $0x18] sm:$0xff]  ;;  %v1402_v60 = vld [vmem:[%s3307_s1 + $0x50] sm:$0xff]  ;;  %p2098_p0 = scmp.ne.s32.totalorder %s2096_s13, %s2097_s14  ;;  %p2103_p4 = scmp.lt.s32.totalorder %s2101_s24, %s2097_s14 }
 0x1d7   : > { %v1353_v32 = vmax.f32 %v1297_v46, 0.0  ;;  %v1436_v46 = vld [vmem:[%s3307_s1 + $0x160] sm:$0xff]  ;;  %v1399_v15 = vld [vmem:[%s3307_s1 + $0x38] sm:$0xff] }
 0x1d8   : > { %v1388_v30 = vmax.f32 %v1332_v34, 0.0  ;;  %v1371_v36 = vmax.f32 %v1315_v62, 0.0  ;;  %1635 = vmatmul.f32.gmra.mxu0 %v1416_v44  ;;  %v1413_v44 = vld [vmem:[%s3307_s1 + $0xa8] sm:$0xff]  ;;  %v1440_v34 = vld [vmem:[%s3307_s1 + $0x180] sm:$0xff]  ;;  %v1406_v62 = vld [vmem:[%s3307_s1 + $0x70] sm:$0xff]  ;;  %p2099_p1 = pnand %p2098_p0, %p2234_p5  ;;  %p2104_p6 = por %p2103_p4, %p2102_p3 }
 0x1d9   : > { %1680 = vmatpush.msra.mxu1 %v1353_v32  ;;  %v1403_v32 = vld [vmem:[%s3307_s1 + $0x58] sm:$0xff] }
 0x1da   : > { %1743 = vmatpush.msra.mxu2 %v1371_v36  ;;  %1807 = vmatpush.msra.mxu3 %v1388_v30  ;;  %v1417_v30 = vld [vmem:[%s3307_s1 + $0xc8] sm:$0xff]  ;;  %v1444_v36 = vld [vmem:[%s3307_s1 + $0x1a0] sm:$0xff]  ;;  %p2100_p2 = pneg %p2099_p1 }
 0x1db   : > { %1681 = vmatpush.msra.mxu1 %v1352_v35  ;;  %v1421_v35 = vld [vmem:[%s3307_s1 + $0xe8] sm:$0xff] }
 0x1dc   : > { %1682 = vmatmul.f32.vlgmr.msra.gmra.mxu1 %v1393_v45  ;;  %v1448_v45 = vld [vmem:[%s3307_s1 + $0x1c0] sm:$0xff]  ;;  %p2105_p7 = pnand %p2104_p6, %p2100_p2 }
 0x1dd   : > { %v1258_v8 = vpop.permute.xlu1 %1257  ;;  %v1173_v48 = vpop.permute.xlu0 %1172 }
 0x1de   : > { %v1331_v2 = vadd.f32 %v1258_v8, %v939_v20  ;;  %v1314_v29 = vadd.f32 %v1173_v48, %v922_v61  ;;  %v1411_v61 = vld [vmem:[%s3307_s1 + $0x98] sm:$0xff]  ;;  %v1452_v20 = vld [vmem:[%s3307_s1 + $0x1e0] sm:$0xff]  ;;  %v1418_v8 = vld [vmem:[%s3307_s1 + $0xd0] sm:$0xff] }
 0x1df   : > { %v1415_v48 = vld [vmem:[%s3307_s1 + $0xb8] sm:$0xff] }
 0x1e0   : > { %v1387_v23 = vmax.f32 %v1331_v2, 0.0  ;;  %v1370_v6 = vmax.f32 %v1314_v29, 0.0  ;;  %1638 = vmatmul.f32.gmra.mxu0 %v1420_v0  ;;  %v1429_v0 = vld [vmem:[%s3307_s1 + $0x128] sm:$0xff]  ;;  %v1422_v2 = vld [vmem:[%s3307_s1 + $0xf0] sm:$0xff]  ;;  %v1419_v29 = vld [vmem:[%s3307_s1 + $0xd8] sm:$0xff] }
 0x1e2   : > { %1744 = vmatpush.msra.mxu2 %v1370_v6  ;;  %1808 = vmatpush.msra.mxu3 %v1387_v23  ;;  %v1433_v23 = vld [vmem:[%s3307_s1 + $0x148] sm:$0xff]  ;;  %v1426_v6 = vld [vmem:[%s3307_s1 + $0x110] sm:$0xff] }
 0x1e4   : > { %1685 = vmatmul.f32.gmra.mxu1 %v1397_v37  ;;  %v1430_v37 = vld [vmem:[%s3307_s1 + $0x130] sm:$0xff] }
 0x1e5   : > { %v1253_v12 = vpop.permute.xlu1 %1252  ;;  %v1168_v9 = vpop.permute.xlu0 %1167 }
 0x1e6   : > { %v1330_v55 = vadd.f32 %v1253_v12, %v938_v58  ;;  %v1313_v10 = vadd.f32 %v1168_v9, %v921_v25  ;;  %v1441_v25 = vld [vmem:[%s3307_s1 + $0x188] sm:$0xff]  ;;  %v1431_v58 = vld [vmem:[%s3307_s1 + $0x138] sm:$0xff]  ;;  %v1438_v9 = vld [vmem:[%s3307_s1 + $0x170] sm:$0xff] }
 0x1e7   : > { %v1445_v12 = vld [vmem:[%s3307_s1 + $0x1a8] sm:$0xff] }
 0x1e8   : > { %v1386_v41 = vmax.f32 %v1330_v55, 0.0  ;;  %v1369_v42 = vmax.f32 %v1313_v10, 0.0  ;;  %1641 = vmatmul.f32.gmra.mxu0 %v1424_v59  ;;  %v1435_v59 = vld [vmem:[%s3307_s1 + $0x158] sm:$0xff]  ;;  %v1449_v55 = vld [vmem:[%s3307_s1 + $0x1c8] sm:$0xff]  ;;  %v1442_v10 = vld [vmem:[%s3307_s1 + $0x190] sm:$0xff] }
 0x1ea   : > { %1745 = vmatpush.msra.mxu2 %v1369_v42  ;;  %1809 = vmatpush.msra.mxu3 %v1386_v41  ;;  %v1439_v41 = vld [vmem:[%s3307_s1 + $0x178] sm:$0xff]  ;;  %v1453_v42 = vld [vmem:[%s3307_s1 + $0x1e8] sm:$0xff] }
 0x1ec   : > { %1688 = vmatmul.f32.gmra.mxu1 %v1401_v19  ;;  %v1446_v19 = vld [vmem:[%s3307_s1 + $0x1b0] sm:$0xff] }
 0x1ed   : > { %v1248_v3 = vpop.permute.xlu1 %1247  ;;  %v1163_v17 = vpop.permute.xlu0 %1162 }
 0x1ee   : > { %v1329_v49 = vadd.f32 %v1248_v3, %v937_v57  ;;  %v1312_v28 = vadd.f32 %v1163_v17, %v920_v26  ;;  %v1450_v57 = vld [vmem:[%s3307_s1 + $0x1d0] sm:$0xff] }
 0x1f0   : > { %v1385_v53 = vmax.f32 %v1329_v49, 0.0  ;;  %1644 = vmatmul.f32.gmra.mxu0 %v1428_v27  ;;  %v1368_v43 = vmax.f32 %v1312_v28, 0.0  ;;  %v1454_v27 = vld [vmem:[%s3307_s1 + $0x1f0] sm:$0xff]  ;;  %v1451_v49 = vld [vmem:[%s3307_s1 + $0x1d8] sm:$0xff] }
 0x1f2   : > { %1810 = vmatpush.msra.mxu3 %v1385_v53  ;;  %1746 = vmatpush.msra.mxu2 %v1368_v43  ;;  %v1455_v53 = vld [vmem:[%s3307_s1 + $0x1f8] sm:$0xff] }
 0x1f3   : > { %1747 = vmatmul.f32.vlgmr.msra.gmra.mxu2 %v1394_v4 }
 0x1f4   : > { %1691 = vmatmul.f32.gmra.mxu1 %v1405_v24 }
 0x1f5   : > { %v1243_v56 = vpop.permute.xlu0 %1242  ;;  %v1475_v38 = vpop.permute.xlu1 %1474 }
 0x1f6   : > { %v1328_v1 = vadd.f32 %v1243_v56, %v936_v5 }
 0x1f8   : > { %1647 = vmatmul.f32.gmra.mxu0 %v1432_v11  ;;  %v1384_v18 = vmax.f32 %v1328_v1, 0.0 }
 0x1fa   : > { %1811 = vmatpush.msra.mxu3 %v1384_v18 }
 0x1fb   : > { %1750 = vmatmul.f32.gmra.mxu2 %v1398_v14  ;;  %1997 = vmatmul.msk.f32.vlgmr.msra.gmra.mxu3 %vm1552_vm0, %v1395_v31  ;;  %v1480_v31 = vpop.permute.xlu2 %1479 }
 0x1fc   : > { %1694 = vmatmul.f32.gmra.mxu1 %v1409_v50 }
 0x200   : > { %1650 = vmatmul.f32.gmra.mxu0 %v1436_v46 }
 0x203   : > { %1753 = vmatmul.f32.gmra.mxu2 %v1402_v60  ;;  %1998 = vmatmul.msk.f32.gmra.mxu3 %vm1552_vm0, %v1399_v15 }
 0x204   : > { %1697 = vmatmul.f32.gmra.mxu1 %v1413_v44 }
 0x208   : > { %1653 = vmatmul.f32.gmra.mxu0 %v1440_v34 }
 0x20b   : > { %1756 = vmatmul.f32.gmra.mxu2 %v1406_v62  ;;  %1999 = vmatmul.msk.f32.gmra.mxu3 %vm1552_vm0, %v1403_v32 }
 0x20c   : > { %1700 = vmatmul.f32.gmra.mxu1 %v1417_v30  ;;  %v1485_v30 = vpop.permute.xlu0 %1484 }
 0x210   : > { %1656 = vmatmul.f32.gmra.mxu0 %v1444_v36 }
 0x213   : > { %1759 = vmatmul.f32.gmra.mxu2 %v1410_v39  ;;  %2000 = vmatmul.msk.f32.gmra.mxu3 %vm1552_vm0, %v1407_v33 }
 0x214   : > { %1703 = vmatmul.f32.gmra.mxu1 %v1421_v35 }
 0x218   : > { %1659 = vmatmul.f32.gmra.mxu0 %v1448_v45 }
 0x21b   : > { %1762 = vmatmul.f32.gmra.mxu2 %v1414_v51  ;;  %2001 = vmatmul.msk.f32.gmra.mxu3 %vm1552_vm0, %v1411_v61 }
 0x21c   : > { %1706 = vmatmul.f32.gmra.mxu1 %v1425_v47 }
 0x220   : > { %1662 = vmatmul.f32.gmra.mxu0 %v1452_v20 }
 0x223   : > { %1765 = vmatmul.f32.gmra.mxu2 %v1418_v8  ;;  %2002 = vmatmul.msk.f32.gmra.mxu3 %vm1552_vm0, %v1415_v48  ;;  %v1490_v8 = vpop.permute.xlu1 %1489 }
 0x224   : > { %1709 = vmatmul.f32.gmra.mxu1 %v1429_v0 }
 0x225   : > { %v1618_v54 = vpop.f32.mrf.mxu0 }
 0x226   : > { %v1619_v22 = vadd.f32 %v1618_v54, %v1475_v38 }
 0x22b   : > { %1768 = vmatmul.f32.gmra.mxu2 %v1422_v2  ;;  %2003 = vmatmul.msk.f32.gmra.mxu3 %vm1552_vm0, %v1419_v29 }
 0x22c   : > { %1712 = vmatmul.f32.gmra.mxu1 %v1433_v23 }
 0x22d   : > { %v1621_v26 = vpop.f32.mrf.mxu0 }
 0x22e   : > { %v1622_v50 = vadd.f32 %v1621_v26, %v1480_v31 }
 0x233   : > { %1771 = vmatmul.f32.gmra.mxu2 %v1426_v6  ;;  %2004 = vmatmul.msk.f32.gmra.mxu3 %vm1552_vm0, %v1423_v7 }
 0x234   : > { %1715 = vmatmul.f32.gmra.mxu1 %v1437_v63 }
 0x235   : > { %v1624_v17 = vpop.f32.mrf.mxu0 }
 0x236   : > { %v1625_v36 = vadd.f32 %v1624_v17, %v1485_v30 }
 0x23b   : > { %1774 = vmatmul.f32.gmra.mxu2 %v1430_v37  ;;  %2005 = vmatmul.msk.f32.gmra.mxu3 %vm1552_vm0, %v1427_v40  ;;  %v1495_v40 = vpop.permute.xlu2 %1494 }
 0x23c   : > { %1718 = vmatmul.f32.gmra.mxu1 %v1441_v25 }
 0x23d   : > { %v1627_v43 = vpop.f32.mrf.mxu0 }
 0x23e   : > { %v1628_v48 = vadd.f32 %v1627_v43, %v1490_v8 }
 0x243   : > { %1777 = vmatmul.f32.gmra.mxu2 %v1434_v16  ;;  %2006 = vmatmul.msk.f32.gmra.mxu3 %vm1552_vm0, %v1431_v58 }
 0x244   : > { %1721 = vmatmul.f32.gmra.mxu1 %v1445_v12 }
 0x245   : > { %v1630_v18 = vpop.f32.mrf.mxu0 }
 0x246   : > { %v1631_v25 = vadd.f32 %v1630_v18, %v1495_v40 }
 0x24b   : > { %1780 = vmatmul.f32.gmra.mxu2 %v1438_v9  ;;  %2007 = vmatmul.msk.f32.gmra.mxu3 %vm1552_vm0, %v1435_v59 }
 0x24c   : > { %1724 = vmatmul.f32.gmra.mxu1 %v1449_v55 }
 0x24d   : > { %v1633_v39 = vpop.f32.mrf.mxu0 }
 0x253   : > { %1783 = vmatmul.f32.gmra.mxu2 %v1442_v10  ;;  %2008 = vmatmul.msk.f32.gmra.mxu3 %vm1552_vm0, %v1439_v41 }
 0x254   : > { %1727 = vmatmul.f32.gmra.mxu1 %v1453_v42  ;;  %v1500_v42 = vpop.permute.xlu0 %1499 }
 0x255   : > { %v1636_v2 = vpop.f32.mrf.mxu0  ;;  %v1634_v54 = vadd.f32 %v1633_v39, %v1500_v42 }
 0x259   : > { %v1683_v52 = vpop.f32.mrf.mxu1 }
 0x25a   : > { %v1684_v5 = vadd.f32 %v1683_v52, %v1619_v22  ;;  %v1510_v22 = vpop.permute.xlu2 %1509 }
 0x25b   : > { %1786 = vmatmul.f32.gmra.mxu2 %v1446_v19  ;;  %2009 = vmatmul.msk.f32.gmra.mxu3 %vm1552_vm0, %v1443_v13 }
 0x25d   : > { %v1639_v12 = vpop.f32.mrf.mxu0 }
 0x261   : > { %v1686_v3 = vpop.f32.mrf.mxu1 }
 0x262   : > { %v1687_v15 = vadd.f32 %v1686_v3, %v1622_v50 }
 0x263   : > { %1789 = vmatmul.f32.gmra.mxu2 %v1450_v57  ;;  %2010 = vmatmul.msk.f32.gmra.mxu3 %vm1552_vm0, %v1447_v21 }
 0x265   : > { %v1642_v26 = vpop.f32.mrf.mxu0 }
 0x269   : > { %v1689_v28 = vpop.f32.mrf.mxu1 }
 0x26a   : > { %v1690_v35 = vadd.f32 %v1689_v28, %v1625_v36 }
 0x26b   : > { %1792 = vmatmul.f32.gmra.mxu2 %v1454_v27  ;;  %2011 = vmatmul.msk.f32.gmra.mxu3 %vm1552_vm0, %v1451_v49  ;;  %v1505_v27 = vpop.permute.xlu1 %1504 }
 0x26c   : > { %v1637_v49 = vadd.f32 %v1636_v2, %v1505_v27  ;;  %v1525_v2 = vpop.permute.xlu2 %1524 }
 0x271   : > { %v1692_v24 = vpop.f32.mrf.mxu1 }
 0x272   : > { %v1693_v29 = vadd.f32 %v1692_v24, %v1628_v48 }
 0x273   : > { %2012 = vmatmul.msk.f32.gmra.mxu3 %vm1552_vm0, %v1455_v53 }
 0x276   : > { %v1748_v4 = vpop.f32.mrf.mxu2 }
 0x277   : > { %v1749_v11 = vadd.f32 %v1748_v4, %v1684_v5  ;;  %v1640_v5 = vadd.f32 %v1639_v12, %v1510_v22 }
 0x279   : > { %v1695_v46 = vpop.f32.mrf.mxu1 }
 0x27a   : > { %v1696_v58 = vadd.f32 %v1695_v46, %v1631_v25 }
 0x27e   : > { %v1751_v56 = vpop.f32.mrf.mxu2  ;;  %v1813_v1 = vpop.f32.mrf.mxu3 }
 0x27f   : > { %v1814_v14 = vadd.f32 %v1813_v1, %v1749_v11  ;;  %v1752_v44 = vadd.f32 %v1751_v56, %v1687_v15  ;;  %v1645_v11 = vpop.f32.mrf.mxu0 }
 0x281   : > { %v1861_v60 = vmax.f32 %v1814_v14, 0.0  ;;  %v1698_v45 = vpop.f32.mrf.mxu1 }
 0x282   : > { %v1699_v13 = vadd.f32 %v1698_v45, %v1634_v54 }
 0x283   : > { %1877 = vst [vmem:[%s3249_s29] sm:$0xff] %v1861_v60  ;;  %v1515_v60 = vpop.permute.xlu0 %1514 }
 0x284   : > { %v1643_v15 = vadd.f32 %v1642_v26, %v1515_v60 }
 0x286   : > { %v1754_v34 = vpop.f32.mrf.mxu2  ;;  %v1816_v62 = vpop.f32.mrf.mxu3 }
 0x287   : > { %v1817_v32 = vadd.f32 %v1816_v62, %v1752_v44  ;;  %v1755_v51 = vadd.f32 %v1754_v34, %v1690_v35  ;;  %v1648_v34 = vpop.f32.mrf.mxu0  ;;  %v1520_v35 = vpop.permute.xlu1 %1519 }
 0x288   : > { %v1646_v45 = vadd.f32 %v1645_v11, %v1520_v35 }
 0x289   : > { %v1862_v33 = vmax.f32 %v1817_v32, 0.0  ;;  %v1701_v23 = vpop.f32.mrf.mxu1 }
 0x28a   : > { %v1702_v53 = vadd.f32 %v1701_v23, %v1637_v49  ;;  %v1649_v23 = vadd.f32 %v1648_v34, %v1525_v2 }
 0x28b   : > { %1878 = vst [vmem:[%s3249_s29 + $0x8] sm:$0xff] %v1862_v33 }
 0x28e   : > { %v1757_v61 = vpop.f32.mrf.mxu2  ;;  %v1819_v47 = vpop.f32.mrf.mxu3 }
 0x28f   : > { %v1820_v20 = vadd.f32 %v1819_v47, %v1755_v51  ;;  %v1758_v6 = vadd.f32 %v1757_v61, %v1693_v29  ;;  %v1651_v47 = vpop.f32.mrf.mxu0 }
 0x291   : > { %v1863_v0 = vmax.f32 %v1820_v20, 0.0  ;;  %v1704_v10 = vpop.f32.mrf.mxu1 }
 0x292   : > { %v1705_v1 = vadd.f32 %v1704_v10, %v1640_v5 }
 0x293   : > { %1879 = vst [vmem:[%s3249_s29 + $0x10] sm:$0xff] %v1863_v0 }
 0x296   : > { %v1760_v7 = vpop.f32.mrf.mxu2  ;;  %v1822_v63 = vpop.f32.mrf.mxu3 }
 0x297   : > { %v1823_v37 = vadd.f32 %v1822_v63, %v1758_v6  ;;  %v1761_v9 = vadd.f32 %v1760_v7, %v1696_v58  ;;  %v1654_v58 = vpop.f32.mrf.mxu0 }
 0x299   : > { %v1864_v16 = vmax.f32 %v1823_v37, 0.0  ;;  %v1707_v17 = vpop.f32.mrf.mxu1 }
 0x29a   : > { %v1708_v62 = vadd.f32 %v1707_v17, %v1643_v15 }
 0x29b   : > { %1880 = vst [vmem:[%s3249_s29 + $0x18] sm:$0xff] %v1864_v16  ;;  %v1530_v16 = vpop.permute.xlu0 %1529 }
 0x29c   : > { %v1652_v12 = vadd.f32 %v1651_v47, %v1530_v16 }
 0x29e   : > { %v1763_v59 = vpop.f32.mrf.mxu2  ;;  %v1825_v55 = vpop.f32.mrf.mxu3 }
 0x29f   : > { %v1826_v41 = vadd.f32 %v1825_v55, %v1761_v9  ;;  %v1764_v52 = vadd.f32 %v1763_v59, %v1699_v13 }
 0x2a1   : > { %v1865_v19 = vmax.f32 %v1826_v41, 0.0  ;;  %v1710_v18 = vpop.f32.mrf.mxu1 }
 0x2a2   : > { %v1711_v61 = vadd.f32 %v1710_v18, %v1646_v45 }
 0x2a3   : > { %1881 = vst [vmem:[%s3249_s29 + $0x20] sm:$0xff] %v1865_v19  ;;  %v1535_v19 = vpop.permute.xlu1 %1534 }
 0x2a4   : > { %v1655_v13 = vadd.f32 %v1654_v58, %v1535_v19 }
 0x2a6   : > { %v1766_v57 = vpop.f32.mrf.mxu2  ;;  %v1828_v21 = vpop.f32.mrf.mxu3 }
 0x2a7   : > { %v1829_v3 = vadd.f32 %v1828_v21, %v1764_v52  ;;  %v1767_v43 = vadd.f32 %v1766_v57, %v1702_v53  ;;  %v1657_v57 = vpop.f32.mrf.mxu0 }
 0x2a9   : > { %v1866_v28 = vmax.f32 %v1829_v3, 0.0  ;;  %v1713_v32 = vpop.f32.mrf.mxu1 }
 0x2aa   : > { %v1714_v7 = vadd.f32 %v1713_v32, %v1649_v23 }
 0x2ab   : > { %1882 = vst [vmem:[%s3249_s29 + $0x28] sm:$0xff] %v1866_v28  ;;  %v1540_v28 = vpop.permute.xlu2 %1539 }
 0x2ac   : > { %v1658_v53 = vadd.f32 %v1657_v57, %v1540_v28 }
 0x2ae   : > { %v1769_v4 = vpop.f32.mrf.mxu2  ;;  %v1831_v24 = vpop.f32.mrf.mxu3 }
 0x2af   : > { %v1832_v38 = vadd.f32 %v1831_v24, %v1767_v43  ;;  %v1770_v14 = vadd.f32 %v1769_v4, %v1705_v1  ;;  %v1660_v24 = vpop.f32.mrf.mxu0 }
 0x2b1   : > { %v1867_v56 = vmax.f32 %v1832_v38, 0.0  ;;  %v1716_v29 = vpop.f32.mrf.mxu1 }
 0x2b2   : > { %v1717_v55 = vadd.f32 %v1716_v29, %v1652_v12 }
 0x2b3   : > { %1883 = vst [vmem:[%s3249_s29 + $0x30] sm:$0xff] %v1867_v56  ;;  %v1545_v56 = vpop.permute.xlu0 %1544 }
 0x2b4   : > { %v1661_v18 = vadd.f32 %v1660_v24, %v1545_v56 }
 0x2b6   : > { %v1772_v31 = vpop.f32.mrf.mxu2  ;;  %v1834_v50 = vpop.f32.mrf.mxu3 }
 0x2b7   : > { %v1835_v46 = vadd.f32 %v1834_v50, %v1770_v14  ;;  %v1773_v30 = vadd.f32 %v1772_v31, %v1708_v62 }
 0x2b9   : > { %v1868_v44 = vmax.f32 %v1835_v46, 0.0  ;;  %v1719_v59 = vpop.f32.mrf.mxu1  ;;  %v1663_v46 = vpop.f32.mrf.mxu0 }
 0x2ba   : > { %v1720_v21 = vadd.f32 %v1719_v59, %v1655_v13 }
 0x2bb   : > { %1884 = vst [vmem:[%s3249_s29 + $0x38] sm:$0xff] %v1868_v44  ;;  %v1550_v44 = vpop.permute.xlu1 %1549 }
 0x2bc   : > { %v1664_v62 = vadd.f32 %v1663_v46, %v1550_v44 }
 0x2be   : > { %v1775_v36 = vpop.f32.mrf.mxu2  ;;  %v1837_v39 = vpop.f32.mrf.mxu3 }
 0x2bf   : > { %v1838_v33 = vadd.f32 %v1837_v39, %v1773_v30  ;;  %v1776_v20 = vadd.f32 %v1775_v36, %v1711_v61 }
 0x2c1   : > { %v1869_v51 = vmax.f32 %v1838_v33, 0.0  ;;  %v1722_v26 = vpop.f32.mrf.mxu1 }
 0x2c2   : > { %v1723_v4 = vadd.f32 %v1722_v26, %v1658_v53 }
 0x2c3   : > { %1885 = vst [vmem:[%s3249_s29 + $0x40] sm:$0xff] %v1869_v51 }
 0x2c6   : > { %v1778_v8 = vpop.f32.mrf.mxu2  ;;  %v1840_v48 = vpop.f32.mrf.mxu3 }
 0x2c7   : > { %v1841_v0 = vadd.f32 %v1840_v48, %v1776_v20  ;;  %v1779_v63 = vadd.f32 %v1778_v8, %v1714_v7 }
 0x2c9   : > { %v1870_v6 = vmax.f32 %v1841_v0, 0.0  ;;  %v1725_v22 = vpop.f32.mrf.mxu1 }
 0x2ca   : > { %v1726_v31 = vadd.f32 %v1725_v22, %v1661_v18 }
 0x2cb   : > { %1886 = vst [vmem:[%s3249_s29 + $0x48] sm:$0xff] %v1870_v6 }
 0x2ce   : > { %v1781_v37 = vpop.f32.mrf.mxu2  ;;  %v1843_v40 = vpop.f32.mrf.mxu3 }
 0x2cf   : > { %v1844_v25 = vadd.f32 %v1843_v40, %v1779_v63  ;;  %v1782_v10 = vadd.f32 %v1781_v37, %v1717_v55 }
 0x2d1   : > { %v1871_v9 = vmax.f32 %v1844_v25, 0.0  ;;  %v1728_v34 = vpop.f32.mrf.mxu1 }
 0x2d2   : > { %v1729_v36 = vadd.f32 %v1728_v34, %v1664_v62 }
 0x2d3   : > { %1887 = vst [vmem:[%s3249_s29 + $0x50] sm:$0xff] %v1871_v9 }
 0x2d6   : > { %v1784_v41 = vpop.f32.mrf.mxu2  ;;  %v1846_v42 = vpop.f32.mrf.mxu3 }
 0x2d7   : > { %v1847_v54 = vadd.f32 %v1846_v42, %v1782_v10  ;;  %v1785_v3 = vadd.f32 %v1784_v41, %v1720_v21 }
 0x2d9   : > { %v1872_v52 = vmax.f32 %v1847_v54, 0.0 }
 0x2db   : > { %1888 = vst [vmem:[%s3249_s29 + $0x58] sm:$0xff] %v1872_v52 }
 0x2de   : > { %v1787_v27 = vpop.f32.mrf.mxu2  ;;  %v1849_v49 = vpop.f32.mrf.mxu3 }
 0x2df   : > { %v1850_v17 = vadd.f32 %v1849_v49, %v1785_v3  ;;  %v1788_v38 = vadd.f32 %v1787_v27, %v1723_v4 }
 0x2e1   : > { %v1873_v43 = vmax.f32 %v1850_v17, 0.0 }
 0x2e3   : > { %1889 = vst [vmem:[%s3249_s29 + $0x60] sm:$0xff] %v1873_v43 }
 0x2e6   : > { %v1852_v5 = vpop.f32.mrf.mxu3  ;;  %v1790_v1 = vpop.f32.mrf.mxu2 }
 0x2e7   : > { %v1853_v11 = vadd.f32 %v1852_v5, %v1788_v38  ;;  %v1791_v50 = vadd.f32 %v1790_v1, %v1726_v31 }
 0x2e9   : > { %v1874_v14 = vmax.f32 %v1853_v11, 0.0 }
 0x2eb   : > { %1890 = vst [vmem:[%s3249_s29 + $0x68] sm:$0xff] %v1874_v14 }
 0x2ee   : > { %v1855_v60 = vpop.f32.mrf.mxu3  ;;  %v1793_v30 = vpop.f32.mrf.mxu2 }
 0x2ef   : > { %v1856_v15 = vadd.f32 %v1855_v60, %v1791_v50  ;;  %v1794_v39 = vadd.f32 %v1793_v30, %v1729_v36 }
 0x2f1   : > { %v1875_v32 = vmax.f32 %v1856_v15, 0.0 }
 0x2f3   : > { %1891 = vst [vmem:[%s3249_s29 + $0x70] sm:$0xff] %v1875_v32 }
 0x2f6   : > { %v1858_v33 = vpop.f32.mrf.mxu3 }
 0x2f7   : > { %v1859_v35 = vadd.f32 %v1858_v33, %v1794_v39 }
 0x2f9   : > { %v1876_v45 = vmax.f32 %v1859_v35, 0.0 }
 0x2fb   : > { %1892 = vst [vmem:[%s3249_s29 + $0x78] sm:$0xff] %v1876_v45 }
 0x2fc   : > { %2108 = shalt.err (!%p2105_p7)
}
 0x2fd   : > { %s2162_s17 = smov 128   ;;  %s2163_s29 = smov 256  }
 0x2fe   : > { %s2164_s7 = smov 8  }
 0x2ff   : > { %2019 = dma.vmem_to_hbm [thread:$0]  (%p2234_p5), %s1908_s10, 2048, %s1910_s11, %s1894_s21, %s2162_s17, %s2163_s29, %s2164_s7  }
 0x300 PF: > { %s1924_s8 = sand.u32 1, %s2139_s18   ;;  %p2022_p8 = pnand %p1993_p10, %p2245_p9 }
 0x301   : > { %s1925_s9 = scalar_lea.sflag [#allocation4], %s1924_s8 }
 0x302   : > { %p2023_p11 = pneg %p2022_p8 }
 0x304   : > { %2134 = dma.done.wait (%p2023_p11), %s1925_s9, 2048  }
 0x305   : > { %2136 = vsyncadd (%p2023_p11), %s1925_s9, 4294965248  ;;  %s18_s23 = sadd.s32 1, %s2159_s23   ;;  %s3356_s18 = smov %s2143_s19 }
 0x306   : > { %p15_p12 = scmp.ge.s32.totalorder %s18_s23, 4   ;;  %s3357_s19 = smov %s2147_s20 }
 0x307   : > { %s3358_s20 = smov %s2243_s30  ;;  %s3359_s21 = smov %s2155_s22 }
 0x308   : > { %s3360_s22 = smov %s3362_s26  ;;  %17 = sbr.rel (!%p15_p12) target bundleno = 4 (0x4), region = 118 }
 0x30d   :  { %1931 = vsyncpa [#allocation4], 1 }
 0x30e   :  { %1933 = vsyncpa [#allocation4 + $0x1], 1 }

</bundles_post_ra>
